<compile_context>
chip_gen: v5e
topology: v5e:2x2
jax: 0.10.0
libtpu: 0.0.40
codegen_flags: <defaults>
</compile_context>

<pallas_src>
import functools

import jax
import jax.numpy as jnp
from jax import lax
from jax.experimental import pallas as pl
from jax.experimental.pallas import tpu as pltpu

NUM_LAYERS = 4  # SimSiam default num_layers


def poke_ae_kernel(sp_idx_ref, mv_idx_ref, ab_idx_ref, it_idx_ref,
                   emb_tbl_ref, wt_ref, bt_ref, wp_ref, bp_ref,
                   proj_ref, torso_ref, *, offsets):
    """One batch tile.  All activations are transposed: (H, TILE_B)."""
    tb = sp_idx_ref.shape[-1]      # lane-dense batch tile (multiple of 128)
    vocab = emb_tbl_ref.shape[1]   # concatenated (padded) vocab

    # ---- encode: fused PokEmb gather as one multi-hot matmul over the -------
    # ---- concatenated table.  Multi-hot accumulated in int32, single convert.
    iota = lax.broadcasted_iota(jnp.int32, (vocab, tb), 0)
    counts = jnp.zeros((vocab, tb), jnp.int32)
    for off, idx_ref in zip(offsets,
                            (sp_idx_ref, mv_idx_ref, ab_idx_ref, it_idx_ref)):
        idx = idx_ref[...] + off                      # (rows, tb), static offset
        for r in range(idx.shape[0]):                 # small static row count
            counts += (iota == idx[r:r + 1, :]).astype(jnp.int32)
    # i32 -> f32 -> bf16: two cheap whole-array converts, done once.
    multihot = counts.astype(jnp.float32).astype(jnp.bfloat16)   # (vocab, tb)

    z = jnp.dot(emb_tbl_ref[...], multihot,
                preferred_element_type=jnp.float32)               # (H, tb) f32

    # ---- SimSiam.torso: Linear/ReLU stack, no final activation (y^T = W^T x^T)
    x = z
    for l in range(NUM_LAYERS):
        x = jnp.dot(wt_ref[l], x.astype(jnp.bfloat16),
                    preferred_element_type=jnp.float32) + bt_ref[l]
        if l < NUM_LAYERS - 1:
            x = jnp.maximum(x, 0.0)
    torso_ref[...] = x.astype(torso_ref.dtype)

    # ---- SimSiam.project: proj(relu(torso(x))) ------------------------------
    h = jnp.maximum(x, 0.0)        # the explicit F.relu in SimSiam.project
    for l in range(NUM_LAYERS):
        h = jnp.dot(wp_ref[l], h.astype(jnp.bfloat16),
                    preferred_element_type=jnp.float32) + bp_ref[l]
        if l < NUM_LAYERS - 1:
            h = jnp.maximum(h, 0.0)
    proj_ref[...] = h.astype(proj_ref.dtype)


def prepare_params(params):
    """One-time (init / param-update) preprocessing, hoisted out of forward().

    Concatenates the four embedding tables along vocab (zero-padded to a
    multiple of 128 lanes), transposes to (H, V_pad), and casts tables / MLP
    weight stacks to bf16 for the MXU fast path.  Offsets are plain Python
    ints and are baked into the kernel as static constants.
    """
    hidden = params["species_emb"].shape[1]
    tables = [params["species_emb"], params["moves_emb"],
              params["abilities_emb"], params["items_emb"]]
    sizes = [int(t.shape[0]) for t in tables]
    offsets = (0,
               sizes[0],
               sizes[0] + sizes[1],
               sizes[0] + sizes[1] + sizes[2])
    v_total = sum(sizes)
    v_pad = ((v_total + 127) // 128) * 128

    emb = jnp.concatenate(tables, axis=0)                         # (V_total, H)
    if v_pad != v_total:
        emb = jnp.concatenate(
            [emb, jnp.zeros((v_pad - v_total, hidden), emb.dtype)], axis=0)

    return {
        "emb_tbl": emb.T.astype(jnp.bfloat16),                    # (H, V_pad)
        "offsets": offsets,                                       # static ints
        "w_torso_t": jnp.swapaxes(params["w_torso"], 1, 2).astype(jnp.bfloat16),
        "b_torso_t": jnp.swapaxes(params["b_torso"], 1, 2),       # (L, H, 1) f32
        "w_proj_t": jnp.swapaxes(params["w_proj"], 1, 2).astype(jnp.bfloat16),
        "b_proj_t": jnp.swapaxes(params["b_proj"], 1, 2),
    }


def poke_emb_ae_forward(prepared, species_idx, moves_idx, abilities_idx,
                        items_idx, *, tile_b=None, transpose_outputs=True):
    """PokeEmbAE.forward.  Returns (proj, torso).

    transpose_outputs=True  -> (B, H) f32, matching the PyTorch module.
    transpose_outputs=False -> kernel-native (H, B) f32 (saves two HBM
                               transposes if the consumer can take it).
    """
    emb_tbl = prepared["emb_tbl"]
    wt, bt = prepared["w_torso_t"], prepared["b_torso_t"]
    wp, bp = prepared["w_proj_t"], prepared["b_proj_t"]
    offsets = prepared["offsets"]

    H = emb_tbl.shape[0]
    B = species_idx.shape[0]
    M = moves_idx.shape[1]

    if tile_b is None:
        # Two lane-dense tiles when possible: shards across v7x's 2 TCs while
        # keeping per-step overhead minimal.  v5e/v6e callers may pass tile_b=B.
        half = B // 2
        tile_b = half if half % 128 == 0 else B
    assert B % tile_b == 0 and tile_b % 128 == 0, \
        "batch must split into lane-dense (multiple-of-128) tiles"

    # Per-call index plumbing (a few KB of int32; cannot be hoisted).
    sp_idx = species_idx.reshape(1, B).astype(jnp.int32)
    mv_idx = moves_idx.T.astype(jnp.int32)                        # (M, B)
    ab_idx = abilities_idx.reshape(1, B).astype(jnp.int32)
    it_idx = items_idx.reshape(1, B).astype(jnp.int32)

    def resident(arr):
        nd = arr.ndim
        return pl.BlockSpec(arr.shape, lambda i: (0,) * nd)

    def batch_cols(rows):
        return pl.BlockSpec((rows, tile_b), lambda i: (0, i))

    act_spec = pl.BlockSpec((H, tile_b), lambda i: (0, i))

    kernel = functools.partial(poke_ae_kernel, offsets=offsets)

    proj_t, torso_t = pl.pallas_call(
        kernel,
        out_shape=(jax.ShapeDtypeStruct((H, B), jnp.float32),     # proj^T
                   jax.ShapeDtypeStruct((H, B), jnp.float32)),    # torso^T
        grid=(B // tile_b,),
        in_specs=[batch_cols(1), batch_cols(M), batch_cols(1), batch_cols(1),
                  resident(emb_tbl),
                  resident(wt), resident(bt), resident(wp), resident(bp)],
        out_specs=(act_spec, act_spec),
        compiler_params=pltpu.CompilerParams(
            dimension_semantics=("parallel",),
            vmem_limit_bytes=32 * 1024 * 1024),
    )(sp_idx, mv_idx, ab_idx, it_idx, emb_tbl, wt, bt, wp, bp)

    if transpose_outputs:
        return proj_t.T, torso_t.T
    return proj_t, torso_t


def reference_forward(params, species_idx, moves_idx, abilities_idx, items_idx,
                      *, mimic_bf16=False):
    """Pure-JAX reference.  mimic_bf16=True rounds params/activations to bf16
    exactly like the kernel does (tight check); False is the pure-f32 module."""
    def rnd(x):
        return x.astype(jnp.bfloat16).astype(jnp.float32) if mimic_bf16 else x

    z = (rnd(params["species_emb"])[species_idx]
         + rnd(params["moves_emb"])[moves_idx].sum(axis=1)
         + rnd(params["abilities_emb"])[abilities_idx]
         + rnd(params["items_emb"])[items_idx])

    def mlp(x, W, b):
        for l in range(NUM_LAYERS):
            x = jnp.dot(rnd(x), rnd(W[l]),
                        precision=lax.Precision.HIGHEST) + b[l, 0]
            if l < NUM_LAYERS - 1:
                x = jnp.maximum(x, 0.0)
        return x

    torso = mlp(z, params["w_torso"], params["b_torso"])
    proj = mlp(jnp.maximum(torso, 0.0), params["w_proj"], params["b_proj"])
    return proj, torso


def make_params(key, hidden, n_species, n_moves, n_abilities, n_items):
    ks = jax.random.split(key, 8)
    bound = 1.0 / jnp.sqrt(hidden)
    return {
        # embedding tables (PyTorch nn.Embedding default ~ N(0, 1))
        "species_emb":   jax.random.normal(ks[0], (n_species, hidden), jnp.float32),
        "moves_emb":     jax.random.normal(ks[1], (n_moves, hidden), jnp.float32),
        "abilities_emb": jax.random.normal(ks[2], (n_abilities, hidden), jnp.float32),
        "items_emb":     jax.random.normal(ks[3], (n_items, hidden), jnp.float32),
        # SimSiam MLP stacks, (L, in, out) / (L, 1, out), uniform +-1/sqrt(fan_in)
        "w_torso": jax.random.uniform(ks[4], (NUM_LAYERS, hidden, hidden),
                                      jnp.float32, -bound, bound),
        "b_torso": jax.random.uniform(ks[5], (NUM_LAYERS, 1, hidden),
                                      jnp.float32, -bound, bound),
        "w_proj":  jax.random.uniform(ks[6], (NUM_LAYERS, hidden, hidden),
                                      jnp.float32, -bound, bound),
        "b_proj":  jax.random.uniform(ks[7], (NUM_LAYERS, 1, hidden),
                                      jnp.float32, -bound, bound),
    }


if __name__ == "__main__":
    key = jax.random.PRNGKey(0)

    B = 256        # batch of pokemon (2 lane-dense tiles of 128)
    H = 32         # hidden_size
    M = 4          # move slots per pokemon
    N_SPECIES, N_MOVES, N_ABILITIES, N_ITEMS = 64, 128, 32, 32

    k_param, k_sp, k_mv, k_ab, k_it = jax.random.split(key, 5)
    params = make_params(k_param, H, N_SPECIES, N_MOVES, N_ABILITIES, N_ITEMS)

    species_idx   = jax.random.randint(k_sp, (B,),    0, N_SPECIES,   jnp.int32)
    moves_idx     = jax.random.randint(k_mv, (B, M),  0, N_MOVES,     jnp.int32)
    abilities_idx = jax.random.randint(k_ab, (B,),    0, N_ABILITIES, jnp.int32)
    items_idx     = jax.random.randint(k_it, (B,),    0, N_ITEMS,     jnp.int32)

    # One-time param prep (hoisted out of the per-call forward path).
    prepared = prepare_params(params)
    jax.block_until_ready(prepared["emb_tbl"])

    proj, torso = poke_emb_ae_forward(prepared, species_idx, moves_idx,
                                      abilities_idx, items_idx)
    jax.block_until_ready((proj, torso))
    assert proj.shape == (B, H) and torso.shape == (B, H)

    # Tight check against a precision-matched reference (same bf16 rounding).
    ref_proj_bf, ref_torso_bf = reference_forward(
        params, species_idx, moves_idx, abilities_idx, items_idx, mimic_bf16=True)
    assert jnp.allclose(proj, ref_proj_bf, atol=1e-3, rtol=1e-3)
    assert jnp.allclose(torso, ref_torso_bf, atol=1e-3, rtol=1e-3)

    # Loose check against the pure-f32 module (bf16 MXU weights => ~1% drift).
    ref_proj, ref_torso = reference_forward(
        params, species_idx, moves_idx, abilities_idx, items_idx, mimic_bf16=False)
    assert jnp.allclose(proj, ref_proj, atol=1e-1, rtol=1e-1)
    assert jnp.allclose(torso, ref_torso, atol=1e-1, rtol=1e-1)

    print("KERNEL_OK")
</pallas_src>

<mosaic_0001>
module attributes {stable_mosaic.version = 11 : i64} {
  func.func @poke_ae_kernel(%arg0: i32, %arg1: memref<1x128xi32, #tpu.memory_space<vmem>>, %arg2: memref<4x128xi32, #tpu.memory_space<vmem>>, %arg3: memref<1x128xi32, #tpu.memory_space<vmem>>, %arg4: memref<1x128xi32, #tpu.memory_space<vmem>>, %arg5: memref<32x256xbf16, #tpu.memory_space<vmem>>, %arg6: memref<4x32x32xbf16, #tpu.memory_space<vmem>>, %arg7: memref<4x32x1xf32, #tpu.memory_space<vmem>>, %arg8: memref<4x32x32xbf16, #tpu.memory_space<vmem>>, %arg9: memref<4x32x1xf32, #tpu.memory_space<vmem>>, %arg10: memref<32x128xf32, #tpu.memory_space<vmem>>, %arg11: memref<32x128xf32, #tpu.memory_space<vmem>>) attributes {dimension_semantics = [#tpu.dimension_semantics<parallel>], iteration_bounds = array<i64: 2>, scalar_prefetch = 0 : i64, scratch_operands = 0 : i64, tpu.core_type = #tpu.core_type<tc>, window_params = [{transform_indices = @transform_0, window_bounds = array<i64: 1, 128>}, {transform_indices = @transform_1, window_bounds = array<i64: 4, 128>}, {transform_indices = @transform_2, window_bounds = array<i64: 1, 128>}, {transform_indices = @transform_3, window_bounds = array<i64: 1, 128>}, {pipeline_mode = #tpu.pipeline_mode<synchronous>, transform_indices = @transform_4, window_bounds = array<i64: 32, 256>}, {pipeline_mode = #tpu.pipeline_mode<synchronous>, transform_indices = @transform_5, window_bounds = array<i64: 4, 32, 32>}, {pipeline_mode = #tpu.pipeline_mode<synchronous>, transform_indices = @transform_6, window_bounds = array<i64: 4, 32, 1>}, {pipeline_mode = #tpu.pipeline_mode<synchronous>, transform_indices = @transform_7, window_bounds = array<i64: 4, 32, 32>}, {pipeline_mode = #tpu.pipeline_mode<synchronous>, transform_indices = @transform_8, window_bounds = array<i64: 4, 32, 1>}, {transform_indices = @transform_9, window_bounds = array<i64: 32, 128>}, {transform_indices = @transform_10, window_bounds = array<i64: 32, 128>}]} {
    %0 = tpu.iota {dimensions = array<i32: 0>} : vector<256x128xi32>
    %c0_i32 = arith.constant 0 : i32
    %1 = vector.broadcast %c0_i32 : i32 to vector<256x128xi32>
    %c0 = arith.constant 0 : index
    %c0_0 = arith.constant 0 : index
    %2 = vector.load %arg1[%c0, %c0_0] : memref<1x128xi32, #tpu.memory_space<vmem>>, vector<1x128xi32>
    %c0_i32_1 = arith.constant 0 : i32
    %3 = vector.broadcast %c0_i32_1 : i32 to vector<1x128xi32>
    %4 = arith.addi %2, %3 : vector<1x128xi32>
    %5 = vector.broadcast %4 : vector<1x128xi32> to vector<256x128xi32>
    %6 = arith.cmpi eq, %0, %5 : vector<256x128xi32>
    %7 = arith.extui %6 : vector<256x128xi1> to vector<256x128xi32>
    %8 = arith.addi %1, %7 : vector<256x128xi32>
    %c0_2 = arith.constant 0 : index
    %c0_3 = arith.constant 0 : index
    %9 = vector.load %arg2[%c0_2, %c0_3] : memref<4x128xi32, #tpu.memory_space<vmem>>, vector<4x128xi32>
    %c64_i32 = arith.constant 64 : i32
    %10 = vector.broadcast %c64_i32 : i32 to vector<4x128xi32>
    %11 = arith.addi %9, %10 : vector<4x128xi32>
    %12 = vector.extract_strided_slice %11 {offsets = [0, 0], sizes = [1, 128], strides = [1, 1]} : vector<4x128xi32> to vector<1x128xi32>
    %13 = vector.broadcast %12 : vector<1x128xi32> to vector<256x128xi32>
    %14 = arith.cmpi eq, %0, %13 : vector<256x128xi32>
    %15 = arith.extui %14 : vector<256x128xi1> to vector<256x128xi32>
    %16 = arith.addi %8, %15 : vector<256x128xi32>
    %17 = vector.extract_strided_slice %11 {offsets = [1, 0], sizes = [1, 128], strides = [1, 1]} : vector<4x128xi32> to vector<1x128xi32>
    %18 = vector.broadcast %17 : vector<1x128xi32> to vector<256x128xi32>
    %19 = arith.cmpi eq, %0, %18 : vector<256x128xi32>
    %20 = arith.extui %19 : vector<256x128xi1> to vector<256x128xi32>
    %21 = arith.addi %16, %20 : vector<256x128xi32>
    %22 = vector.extract_strided_slice %11 {offsets = [2, 0], sizes = [1, 128], strides = [1, 1]} : vector<4x128xi32> to vector<1x128xi32>
    %23 = vector.broadcast %22 : vector<1x128xi32> to vector<256x128xi32>
    %24 = arith.cmpi eq, %0, %23 : vector<256x128xi32>
    %25 = arith.extui %24 : vector<256x128xi1> to vector<256x128xi32>
    %26 = arith.addi %21, %25 : vector<256x128xi32>
    %27 = vector.extract_strided_slice %11 {offsets = [3, 0], sizes = [1, 128], strides = [1, 1]} : vector<4x128xi32> to vector<1x128xi32>
    %28 = vector.broadcast %27 : vector<1x128xi32> to vector<256x128xi32>
    %29 = arith.cmpi eq, %0, %28 : vector<256x128xi32>
    %30 = arith.extui %29 : vector<256x128xi1> to vector<256x128xi32>
    %31 = arith.addi %26, %30 : vector<256x128xi32>
    %c0_4 = arith.constant 0 : index
    %c0_5 = arith.constant 0 : index
    %32 = vector.load %arg3[%c0_4, %c0_5] : memref<1x128xi32, #tpu.memory_space<vmem>>, vector<1x128xi32>
    %c192_i32 = arith.constant 192 : i32
    %33 = vector.broadcast %c192_i32 : i32 to vector<1x128xi32>
    %34 = arith.addi %32, %33 : vector<1x128xi32>
    %35 = vector.broadcast %34 : vector<1x128xi32> to vector<256x128xi32>
    %36 = arith.cmpi eq, %0, %35 : vector<256x128xi32>
    %37 = arith.extui %36 : vector<256x128xi1> to vector<256x128xi32>
    %38 = arith.addi %31, %37 : vector<256x128xi32>
    %c0_6 = arith.constant 0 : index
    %c0_7 = arith.constant 0 : index
    %39 = vector.load %arg4[%c0_6, %c0_7] : memref<1x128xi32, #tpu.memory_space<vmem>>, vector<1x128xi32>
    %c224_i32 = arith.constant 224 : i32
    %40 = vector.broadcast %c224_i32 : i32 to vector<1x128xi32>
    %41 = arith.addi %39, %40 : vector<1x128xi32>
    %42 = vector.broadcast %41 : vector<1x128xi32> to vector<256x128xi32>
    %43 = arith.cmpi eq, %0, %42 : vector<256x128xi32>
    %44 = arith.extui %43 : vector<256x128xi1> to vector<256x128xi32>
    %45 = arith.addi %38, %44 : vector<256x128xi32>
    %46 = arith.sitofp %45 : vector<256x128xi32> to vector<256x128xf32>
    %47 = arith.truncf %46 : vector<256x128xf32> to vector<256x128xbf16>
    %c0_8 = arith.constant 0 : index
    %c0_9 = arith.constant 0 : index
    %48 = vector.load %arg5[%c0_8, %c0_9] : memref<32x256xbf16, #tpu.memory_space<vmem>>, vector<32x256xbf16>
    %cst = arith.constant dense<0.000000e+00> : vector<32x128xf32>
    %49 = tpu.matmul %48, %47, %cst {dimension_numbers = #tpu.dot_dimension_numbers<[1], [0], [0], [1], [0, 0, 1, 1], [], []>} : vector<32x256xbf16>, vector<256x128xbf16>, vector<32x128xf32> -> vector<32x128xf32>
    %c0_10 = arith.constant 0 : index
    %c0_11 = arith.constant 0 : index
    %c0_12 = arith.constant 0 : index
    %50 = vector.load %arg6[%c0_10, %c0_11, %c0_12] : memref<4x32x32xbf16, #tpu.memory_space<vmem>>, vector<1x32x32xbf16>
    %51 = vector.shape_cast %50 : vector<1x32x32xbf16> to vector<32x32xbf16>
    %52 = arith.truncf %49 : vector<32x128xf32> to vector<32x128xbf16>
    %cst_13 = arith.constant dense<0.000000e+00> : vector<32x128xf32>
    %53 = tpu.matmul %51, %52, %cst_13 {dimension_numbers = #tpu.dot_dimension_numbers<[1], [0], [0], [1], [0, 0, 1, 1], [], []>} : vector<32x32xbf16>, vector<32x128xbf16>, vector<32x128xf32> -> vector<32x128xf32>
    %c0_14 = arith.constant 0 : index
    %c0_15 = arith.constant 0 : index
    %c0_16 = arith.constant 0 : index
    %54 = vector.load %arg7[%c0_14, %c0_15, %c0_16] : memref<4x32x1xf32, #tpu.memory_space<vmem>>, vector<1x32x1xf32>
    %55 = vector.shape_cast %54 : vector<1x32x1xf32> to vector<32x1xf32>
    %56 = vector.broadcast %55 : vector<32x1xf32> to vector<32x128xf32>
    %57 = arith.addf %53, %56 : vector<32x128xf32>
    %cst_17 = arith.constant 0.000000e+00 : f32
    %58 = vector.broadcast %cst_17 : f32 to vector<32x128xf32>
    %59 = arith.maximumf %57, %58 : vector<32x128xf32>
    %c1 = arith.constant 1 : index
    %c0_18 = arith.constant 0 : index
    %c0_19 = arith.constant 0 : index
    %60 = vector.load %arg6[%c1, %c0_18, %c0_19] : memref<4x32x32xbf16, #tpu.memory_space<vmem>>, vector<1x32x32xbf16>
    %61 = vector.shape_cast %60 : vector<1x32x32xbf16> to vector<32x32xbf16>
    %62 = arith.truncf %59 : vector<32x128xf32> to vector<32x128xbf16>
    %cst_20 = arith.constant dense<0.000000e+00> : vector<32x128xf32>
    %63 = tpu.matmul %61, %62, %cst_20 {dimension_numbers = #tpu.dot_dimension_numbers<[1], [0], [0], [1], [0, 0, 1, 1], [], []>} : vector<32x32xbf16>, vector<32x128xbf16>, vector<32x128xf32> -> vector<32x128xf32>
    %c1_21 = arith.constant 1 : index
    %c0_22 = arith.constant 0 : index
    %c0_23 = arith.constant 0 : index
    %64 = vector.load %arg7[%c1_21, %c0_22, %c0_23] : memref<4x32x1xf32, #tpu.memory_space<vmem>>, vector<1x32x1xf32>
    %65 = vector.shape_cast %64 : vector<1x32x1xf32> to vector<32x1xf32>
    %66 = vector.broadcast %65 : vector<32x1xf32> to vector<32x128xf32>
    %67 = arith.addf %63, %66 : vector<32x128xf32>
    %cst_24 = arith.constant 0.000000e+00 : f32
    %68 = vector.broadcast %cst_24 : f32 to vector<32x128xf32>
    %69 = arith.maximumf %67, %68 : vector<32x128xf32>
    %c2 = arith.constant 2 : index
    %c0_25 = arith.constant 0 : index
    %c0_26 = arith.constant 0 : index
    %70 = vector.load %arg6[%c2, %c0_25, %c0_26] : memref<4x32x32xbf16, #tpu.memory_space<vmem>>, vector<1x32x32xbf16>
    %71 = vector.shape_cast %70 : vector<1x32x32xbf16> to vector<32x32xbf16>
    %72 = arith.truncf %69 : vector<32x128xf32> to vector<32x128xbf16>
    %cst_27 = arith.constant dense<0.000000e+00> : vector<32x128xf32>
    %73 = tpu.matmul %71, %72, %cst_27 {dimension_numbers = #tpu.dot_dimension_numbers<[1], [0], [0], [1], [0, 0, 1, 1], [], []>} : vector<32x32xbf16>, vector<32x128xbf16>, vector<32x128xf32> -> vector<32x128xf32>
    %c2_28 = arith.constant 2 : index
    %c0_29 = arith.constant 0 : index
    %c0_30 = arith.constant 0 : index
    %74 = vector.load %arg7[%c2_28, %c0_29, %c0_30] : memref<4x32x1xf32, #tpu.memory_space<vmem>>, vector<1x32x1xf32>
    %75 = vector.shape_cast %74 : vector<1x32x1xf32> to vector<32x1xf32>
    %76 = vector.broadcast %75 : vector<32x1xf32> to vector<32x128xf32>
    %77 = arith.addf %73, %76 : vector<32x128xf32>
    %cst_31 = arith.constant 0.000000e+00 : f32
    %78 = vector.broadcast %cst_31 : f32 to vector<32x128xf32>
    %79 = arith.maximumf %77, %78 : vector<32x128xf32>
    %c3 = arith.constant 3 : index
    %c0_32 = arith.constant 0 : index
    %c0_33 = arith.constant 0 : index
    %80 = vector.load %arg6[%c3, %c0_32, %c0_33] : memref<4x32x32xbf16, #tpu.memory_space<vmem>>, vector<1x32x32xbf16>
    %81 = vector.shape_cast %80 : vector<1x32x32xbf16> to vector<32x32xbf16>
    %82 = arith.truncf %79 : vector<32x128xf32> to vector<32x128xbf16>
    %cst_34 = arith.constant dense<0.000000e+00> : vector<32x128xf32>
    %83 = tpu.matmul %81, %82, %cst_34 {dimension_numbers = #tpu.dot_dimension_numbers<[1], [0], [0], [1], [0, 0, 1, 1], [], []>} : vector<32x32xbf16>, vector<32x128xbf16>, vector<32x128xf32> -> vector<32x128xf32>
    %c3_35 = arith.constant 3 : index
    %c0_36 = arith.constant 0 : index
    %c0_37 = arith.constant 0 : index
    %84 = vector.load %arg7[%c3_35, %c0_36, %c0_37] : memref<4x32x1xf32, #tpu.memory_space<vmem>>, vector<1x32x1xf32>
    %85 = vector.shape_cast %84 : vector<1x32x1xf32> to vector<32x1xf32>
    %86 = vector.broadcast %85 : vector<32x1xf32> to vector<32x128xf32>
    %87 = arith.addf %83, %86 : vector<32x128xf32>
    %c0_38 = arith.constant 0 : index
    %c0_39 = arith.constant 0 : index
    %88 = vector.load %arg11[%c0_38, %c0_39] : memref<32x128xf32, #tpu.memory_space<vmem>>, vector<32x128xf32>
    tpu.vector_store %arg11[%c0_38, %c0_39], %87 {strides = array<i32>} : memref<32x128xf32, #tpu.memory_space<vmem>>, vector<32x128xf32>,
    %cst_40 = arith.constant 0.000000e+00 : f32
    %89 = vector.broadcast %cst_40 : f32 to vector<32x128xf32>
    %90 = arith.maximumf %87, %89 : vector<32x128xf32>
    %c0_41 = arith.constant 0 : index
    %c0_42 = arith.constant 0 : index
    %c0_43 = arith.constant 0 : index
    %91 = vector.load %arg8[%c0_41, %c0_42, %c0_43] : memref<4x32x32xbf16, #tpu.memory_space<vmem>>, vector<1x32x32xbf16>
    %92 = vector.shape_cast %91 : vector<1x32x32xbf16> to vector<32x32xbf16>
    %93 = arith.truncf %90 : vector<32x128xf32> to vector<32x128xbf16>
    %cst_44 = arith.constant dense<0.000000e+00> : vector<32x128xf32>
    %94 = tpu.matmul %92, %93, %cst_44 {dimension_numbers = #tpu.dot_dimension_numbers<[1], [0], [0], [1], [0, 0, 1, 1], [], []>} : vector<32x32xbf16>, vector<32x128xbf16>, vector<32x128xf32> -> vector<32x128xf32>
    %c0_45 = arith.constant 0 : index
    %c0_46 = arith.constant 0 : index
    %c0_47 = arith.constant 0 : index
    %95 = vector.load %arg9[%c0_45, %c0_46, %c0_47] : memref<4x32x1xf32, #tpu.memory_space<vmem>>, vector<1x32x1xf32>
    %96 = vector.shape_cast %95 : vector<1x32x1xf32> to vector<32x1xf32>
    %97 = vector.broadcast %96 : vector<32x1xf32> to vector<32x128xf32>
    %98 = arith.addf %94, %97 : vector<32x128xf32>
    %cst_48 = arith.constant 0.000000e+00 : f32
    %99 = vector.broadcast %cst_48 : f32 to vector<32x128xf32>
    %100 = arith.maximumf %98, %99 : vector<32x128xf32>
    %c1_49 = arith.constant 1 : index
    %c0_50 = arith.constant 0 : index
    %c0_51 = arith.constant 0 : index
    %101 = vector.load %arg8[%c1_49, %c0_50, %c0_51] : memref<4x32x32xbf16, #tpu.memory_space<vmem>>, vector<1x32x32xbf16>
    %102 = vector.shape_cast %101 : vector<1x32x32xbf16> to vector<32x32xbf16>
    %103 = arith.truncf %100 : vector<32x128xf32> to vector<32x128xbf16>
    %cst_52 = arith.constant dense<0.000000e+00> : vector<32x128xf32>
    %104 = tpu.matmul %102, %103, %cst_52 {dimension_numbers = #tpu.dot_dimension_numbers<[1], [0], [0], [1], [0, 0, 1, 1], [], []>} : vector<32x32xbf16>, vector<32x128xbf16>, vector<32x128xf32> -> vector<32x128xf32>
    %c1_53 = arith.constant 1 : index
    %c0_54 = arith.constant 0 : index
    %c0_55 = arith.constant 0 : index
    %105 = vector.load %arg9[%c1_53, %c0_54, %c0_55] : memref<4x32x1xf32, #tpu.memory_space<vmem>>, vector<1x32x1xf32>
    %106 = vector.shape_cast %105 : vector<1x32x1xf32> to vector<32x1xf32>
    %107 = vector.broadcast %106 : vector<32x1xf32> to vector<32x128xf32>
    %108 = arith.addf %104, %107 : vector<32x128xf32>
    %cst_56 = arith.constant 0.000000e+00 : f32
    %109 = vector.broadcast %cst_56 : f32 to vector<32x128xf32>
    %110 = arith.maximumf %108, %109 : vector<32x128xf32>
    %c2_57 = arith.constant 2 : index
    %c0_58 = arith.constant 0 : index
    %c0_59 = arith.constant 0 : index
    %111 = vector.load %arg8[%c2_57, %c0_58, %c0_59] : memref<4x32x32xbf16, #tpu.memory_space<vmem>>, vector<1x32x32xbf16>
    %112 = vector.shape_cast %111 : vector<1x32x32xbf16> to vector<32x32xbf16>
    %113 = arith.truncf %110 : vector<32x128xf32> to vector<32x128xbf16>
    %cst_60 = arith.constant dense<0.000000e+00> : vector<32x128xf32>
    %114 = tpu.matmul %112, %113, %cst_60 {dimension_numbers = #tpu.dot_dimension_numbers<[1], [0], [0], [1], [0, 0, 1, 1], [], []>} : vector<32x32xbf16>, vector<32x128xbf16>, vector<32x128xf32> -> vector<32x128xf32>
    %c2_61 = arith.constant 2 : index
    %c0_62 = arith.constant 0 : index
    %c0_63 = arith.constant 0 : index
    %115 = vector.load %arg9[%c2_61, %c0_62, %c0_63] : memref<4x32x1xf32, #tpu.memory_space<vmem>>, vector<1x32x1xf32>
    %116 = vector.shape_cast %115 : vector<1x32x1xf32> to vector<32x1xf32>
    %117 = vector.broadcast %116 : vector<32x1xf32> to vector<32x128xf32>
    %118 = arith.addf %114, %117 : vector<32x128xf32>
    %cst_64 = arith.constant 0.000000e+00 : f32
    %119 = vector.broadcast %cst_64 : f32 to vector<32x128xf32>
    %120 = arith.maximumf %118, %119 : vector<32x128xf32>
    %c3_65 = arith.constant 3 : index
    %c0_66 = arith.constant 0 : index
    %c0_67 = arith.constant 0 : index
    %121 = vector.load %arg8[%c3_65, %c0_66, %c0_67] : memref<4x32x32xbf16, #tpu.memory_space<vmem>>, vector<1x32x32xbf16>
    %122 = vector.shape_cast %121 : vector<1x32x32xbf16> to vector<32x32xbf16>
    %123 = arith.truncf %120 : vector<32x128xf32> to vector<32x128xbf16>
    %cst_68 = arith.constant dense<0.000000e+00> : vector<32x128xf32>
    %124 = tpu.matmul %122, %123, %cst_68 {dimension_numbers = #tpu.dot_dimension_numbers<[1], [0], [0], [1], [0, 0, 1, 1], [], []>} : vector<32x32xbf16>, vector<32x128xbf16>, vector<32x128xf32> -> vector<32x128xf32>
    %c3_69 = arith.constant 3 : index
    %c0_70 = arith.constant 0 : index
    %c0_71 = arith.constant 0 : index
    %125 = vector.load %arg9[%c3_69, %c0_70, %c0_71] : memref<4x32x1xf32, #tpu.memory_space<vmem>>, vector<1x32x1xf32>
    %126 = vector.shape_cast %125 : vector<1x32x1xf32> to vector<32x1xf32>
    %127 = vector.broadcast %126 : vector<32x1xf32> to vector<32x128xf32>
    %128 = arith.addf %124, %127 : vector<32x128xf32>
    %c0_72 = arith.constant 0 : index
    %c0_73 = arith.constant 0 : index
    %129 = vector.load %arg10[%c0_72, %c0_73] : memref<32x128xf32, #tpu.memory_space<vmem>>, vector<32x128xf32>
    tpu.vector_store %arg10[%c0_72, %c0_73], %128 {strides = array<i32>} : memref<32x128xf32, #tpu.memory_space<vmem>>, vector<32x128xf32>,
    return
  }
  func.func @transform_0(%arg0: i32) -> (i32, i32) {
    %c0_i32 = arith.constant 0 : i32
    %c0_i32_0 = arith.constant 0 : i32
    return %c0_i32, %arg0 : i32, i32
  }
  func.func @transform_1(%arg0: i32) -> (i32, i32) {
    %c0_i32 = arith.constant 0 : i32
    %c0_i32_0 = arith.constant 0 : i32
    return %c0_i32, %arg0 : i32, i32
  }
  func.func @transform_2(%arg0: i32) -> (i32, i32) {
    %c0_i32 = arith.constant 0 : i32
    %c0_i32_0 = arith.constant 0 : i32
    return %c0_i32, %arg0 : i32, i32
  }
  func.func @transform_3(%arg0: i32) -> (i32, i32) {
    %c0_i32 = arith.constant 0 : i32
    %c0_i32_0 = arith.constant 0 : i32
    return %c0_i32, %arg0 : i32, i32
  }
  func.func @transform_4(%arg0: i32) -> (i32, i32) {
    %c0_i32 = arith.constant 0 : i32
    %c0_i32_0 = arith.constant 0 : i32
    %c0_i32_1 = arith.constant 0 : i32
    return %c0_i32, %c0_i32_0 : i32, i32
  }
  func.func @transform_5(%arg0: i32) -> (i32, i32, i32) {
    %c0_i32 = arith.constant 0 : i32
    %c0_i32_0 = arith.constant 0 : i32
    %c0_i32_1 = arith.constant 0 : i32
    %c0_i32_2 = arith.constant 0 : i32
    return %c0_i32, %c0_i32_0, %c0_i32_1 : i32, i32, i32
  }
  func.func @transform_6(%arg0: i32) -> (i32, i32, i32) {
    %c0_i32 = arith.constant 0 : i32
    %c0_i32_0 = arith.constant 0 : i32
    %c0_i32_1 = arith.constant 0 : i32
    %c0_i32_2 = arith.constant 0 : i32
    return %c0_i32, %c0_i32_0, %c0_i32_1 : i32, i32, i32
  }
  func.func @transform_7(%arg0: i32) -> (i32, i32, i32) {
    %c0_i32 = arith.constant 0 : i32
    %c0_i32_0 = arith.constant 0 : i32
    %c0_i32_1 = arith.constant 0 : i32
    %c0_i32_2 = arith.constant 0 : i32
    return %c0_i32, %c0_i32_0, %c0_i32_1 : i32, i32, i32
  }
  func.func @transform_8(%arg0: i32) -> (i32, i32, i32) {
    %c0_i32 = arith.constant 0 : i32
    %c0_i32_0 = arith.constant 0 : i32
    %c0_i32_1 = arith.constant 0 : i32
    %c0_i32_2 = arith.constant 0 : i32
    return %c0_i32, %c0_i32_0, %c0_i32_1 : i32, i32, i32
  }
  func.func @transform_9(%arg0: i32) -> (i32, i32) {
    %c0_i32 = arith.constant 0 : i32
    %c0_i32_0 = arith.constant 0 : i32
    return %c0_i32, %arg0 : i32, i32
  }
  func.func @transform_10(%arg0: i32) -> (i32, i32) {
    %c0_i32 = arith.constant 0 : i32
    %c0_i32_0 = arith.constant 0 : i32
    return %c0_i32, %arg0 : i32, i32
  }
}

</mosaic_0001>

<bundles_post_ra>
// kernel: tpu_custom_call.1
= control target key start
LH: loop header
LB: loop body
LE: loop exit
PB: predicated region body
PF: predicated region fallthrough
CT: control target
= control target key end

     0   :  { %s3281_s0 = inlined_call_operand.vmem [shape: s32[1,256], index: 0, kind: input, shape index: {}]   ;;  %s3282_s1 = inlined_call_operand.vmem [shape: s32[4,256], index: 1, kind: input, shape index: {}]   ;;  %s3283_s2 = inlined_call_operand.vmem [shape: s32[1,256], index: 2, kind: input, shape index: {}]   ;;  %s3284_s3 = inlined_call_operand.vmem [shape: s32[1,256], index: 3, kind: input, shape index: {}]   ;;  %s3285_s4 = inlined_call_operand.vmem [shape: bf16[32,256], index: 4, kind: input, shape index: {}]   ;;  %s3286_s5 = inlined_call_operand.vmem [shape: bf16[4,32,32], index: 5, kind: input, shape index: {}]   ;;  %s3287_s6 = inlined_call_operand.vmem [shape: f32[4,32,1], index: 6, kind: input, shape index: {}]   ;;  %s3288_s7 = inlined_call_operand.vmem [shape: bf16[4,32,32], index: 7, kind: input, shape index: {}]   ;;  %s3289_s8 = inlined_call_operand.vmem [shape: f32[4,32,1], index: 8, kind: input, shape index: {}]   ;;  %s3290_s9 = inlined_call_operand.hbm [shape: f32[32,256], index: 9, kind: output, shape index: {0}]   ;;  %s3291_s10 = inlined_call_operand.hbm [shape: f32[32,256], index: 10, kind: output, shape index: {1}]  }
   0x1   :  { %3293 = sst [smem:[#allocation8_spill]] %s3281_s0 }
   0x2   :  { %3294 = sst [smem:[#allocation9_spill]] %s3282_s1 }
   0x3   :  { %3295 = sst [smem:[#allocation10_spill]] %s3283_s2 }
   0x4   :  { %3296 = sst [smem:[#allocation11_spill]] %s3284_s3 }
   0x5   :  { %16 = vsyncpa [#allocation3], 0 }
   0x6   :  { %18 = vsyncpa [#allocation3 + $0x1], 0 }
   0x7   :  { %19 = vsyncpa [#allocation5], 0 }
   0x8   :  { %21 = vsyncpa [#allocation5 + $0x1], 0  ;;  %s2318_s13 = smov 0   ;;  %s2320_s14 = smov 0  }
   0x9   :  { %s2322_s15 = smov 0   ;;  %s2324_s16 = smov 0  }
   0xa LB: > { %s2339_s17 = sadd.s32 4294967295, %s2257_s16   ;;  %s1933_s18 = sadd.s32 4294967294, %s2257_s16   ;;  %s2257_s16 = sphi %s2324_s16, %s3307_s16   ;;  %s2253_s15 = sphi %s2322_s15, %s3306_s15   ;;  %s2249_s14 = sphi %s2320_s14, %s3305_s14   ;;  %s2245_s13 = sphi %s2318_s13, %s3304_s13  }
   0xb   : > { %s2343_s19 = sadd.s32 1, %s2257_s16   ;;  %s243_s20 = sadd.s32 1, %s2253_s15 }
   0xc   : > { %s240_s21 = ssub.s32 %s2257_s16, %s2343_s19  ;;  %p253_p0 = scmp.ne.s32.totalorder %s2253_s15, %s2249_s14 }
   0xd   : > { %p241_p1 = scmp.eq.s32.totalorder %s240_s21, 0  ;;  %p254_p2 = scmp.eq.s32.totalorder %s2339_s17, 1 }
   0xe   : > { %p259_p3 = scmp.ne.s32.totalorder %s2249_s14, %s2245_s13  ;;  %p260_p4 = scmp.eq.s32.totalorder %s1933_s18, 1 }
   0xf   : > { %s2354_s22 = scalar_select %p241_p1, %s2253_s15, %s243_s20  }
  0x10   : > { %p2356_p5 = por %p254_p2, %p253_p0  ;;  %p2360_p6 = por %p260_p4, %p259_p3 }
  0x11   : > { %p1936_p7 = scmp.ge.s32.totalorder %s2257_s16, 1  ;;  %p344_p8 = scmp.lt.s32.totalorder %s2257_s16, 3 }
  0x13   : > { %p345_p9 = pnand %p1936_p7, %p344_p8 }
  0x14   : > { %p395_p10 = scmp.lt.s32.totalorder (!%p345_p9), %s2339_s17, 1  ;;  %s3299_s0 = sld [smem:[#allocation8_spill]] (!%p345_p9) }
  0x15   : > { %348 = sbr.rel (%p345_p9) target bundleno = 1715 (0x6b3), region = 56  ;;  %s3300_s1 = sld [smem:[#allocation9_spill]] (!%p345_p9) }
  0x16   : > { %s3301_s2 = sld [smem:[#allocation10_spill]] (!%p345_p9)  ;;  %s2086_s27 = sshll.u32 (!%p345_p9), %s2339_s17, 3 }
  0x17   : > { %s3302_s3 = sld [smem:[#allocation11_spill]] (!%p345_p9)  ;;  %s1807_s11 = scalar_lea.hbm (!%p345_p9), %s3291_s10, %s2086_s27 }
  0x1a   : > { %v409_v0 = vlaneseq  ;;  %v2259_v1 = vmov 0   ;;  %s396_s25 = scalar_select %p395_p10, %s2339_s17, 1 }
  0x1b   : > { %2158 = vset.pattern.permute.xlu0 %v2259_v1  ;;  %2159 = vset.pattern.permute.xlu1 %v2259_v1 }
  0x1c   : > { %v2370_v2 = vshrl.u32 %v409_v0, 7  ;;  %2160 = vset.pattern.permute.xlu2 %v2259_v1  ;;  %s2376_s28 = scalar_lea.vmem %s3299_s0, %s396_s25  ;;  %s1939_s29 = sshll.u32 %s396_s25, 2 }
  0x1d   : > { %s401_s12 = scalar_lea.vmem %s3300_s1, %s1939_s29  ;;  %s404_s21 = scalar_lea.vmem %s3301_s2, %s396_s25  ;;  %v2393_v7 = vld [vmem:[%s2376_s28] ss:$0 sm:$0xff] }
  0x1e   : > { %v424_v3 = vadd.s32 112, %v2370_v2  ;;  %v425_v4 = vadd.s32 120, %v2370_v2  ;;  %v2381_v5 = vadd.s32 240, %v2370_v2  ;;  %v2384_v6 = vadd.s32 248, %v2370_v2  ;;  %s407_s0 = scalar_lea.vmem %s3302_s3, %s396_s25  ;;  %v508_v10 = vld [vmem:[%s401_s12] sm:$0xf] }
  0x1f   : > { %v2396_v8 = vadd.s32 96, %v2370_v2  ;;  %v2399_v9 = vadd.s32 104, %v2370_v2  ;;  %v898_v11 = vld [vmem:[%s404_s21] sm:$0x1]  ;;  %v2405_v12 = vadd.s32 224, %v2370_v2  ;;  %v2408_v13 = vadd.s32 232, %v2370_v2 }
  0x20   : > { %vm458_vm0 = vcmp.eq.s32.totalorder %v424_v3, %v2393_v7  ;;  %vm459_vm1 = vcmp.eq.s32.totalorder %v425_v4, %v2393_v7  ;;  %v509_v14 = vadd.s32 64, %v508_v10  ;;  %v899_v15 = vadd.s32 192, %v898_v11  ;;  %v997_v16 = vld [vmem:[%s407_s0] sm:$0x1]  ;;  %s3179_s0 = sand.u32 1, %s2249_s14  }
  0x21   : > { %v490_v17 = vsel %vm458_vm0, 1, %v2259_v1  ;;  %v491_v18 = vsel %vm459_vm1, 1, %v2259_v1  ;;  %v998_v19 = vadd.s32 224, %v997_v16  ;;  %vm474_vm2 = vcmp.eq.s32.totalorder %v2381_v5, %v2393_v7  ;;  %s3292_s25 = sshll.u32 %s3179_s0, 5  ;;  %s1781_s12 = scalar_lea.sflag [#allocation5], %s3179_s0 }
  0x22   : > { %v2416_v20 = vperm.slane %v509_v14, 0  ;;  %v2418_v21 = vperm.slane %v509_v14, 1  ;;  %v2420_v22 = vperm.slane %v509_v14, 2  ;;  %v2422_v23 = vperm.slane %v509_v14, 3 }
  0x23   : > { %v2424_v24 = vperm.slane %v899_v15, 0  ;;  %v2426_v25 = vperm.slane %v998_v19, 0  ;;  %vm475_vm3 = vcmp.eq.s32.totalorder %v2384_v6, %v2393_v7  ;;  %v506_v26 = vsel %vm474_vm2, 1, %v2259_v1 }
  0x24   : > { %vm525_vm4 = vcmp.eq.s32.totalorder %v424_v3, %v2416_v20  ;;  %vm526_vm5 = vcmp.eq.s32.totalorder %v425_v4, %v2416_v20  ;;  %vm622_vm6 = vcmp.eq.s32.totalorder %v424_v3, %v2418_v21  ;;  %vm623_vm7 = vcmp.eq.s32.totalorder %v425_v4, %v2418_v21 }
  0x25   : > { %v557_v27 = vsel %vm525_vm4, 1, %v2259_v1  ;;  %v558_v28 = vsel %vm526_vm5, 1, %v2259_v1  ;;  %v654_v29 = vsel %vm622_vm6, 1, %v2259_v1  ;;  %v655_v30 = vsel %vm623_vm7, 1, %v2259_v1 }
  0x26   : > { %v589_v31 = vadd.s32 %v557_v27, %v490_v17  ;;  %v590_v32 = vadd.s32 %v558_v28, %v491_v18  ;;  %vm719_vm8 = vcmp.eq.s32.totalorder %v424_v3, %v2420_v22  ;;  %vm720_vm9 = vcmp.eq.s32.totalorder %v425_v4, %v2420_v22 }
  0x27   : > { %v751_v33 = vsel %vm719_vm8, 1, %v2259_v1  ;;  %v752_v34 = vsel %vm720_vm9, 1, %v2259_v1  ;;  %vm816_vm10 = vcmp.eq.s32.totalorder %v424_v3, %v2422_v23  ;;  %vm817_vm11 = vcmp.eq.s32.totalorder %v425_v4, %v2422_v23 }
  0x28   : > { %v686_v35 = vadd.s32 %v654_v29, %v589_v31  ;;  %v687_v36 = vadd.s32 %v655_v30, %v590_v32  ;;  %v848_v37 = vsel %vm816_vm10, 1, %v2259_v1  ;;  %v849_v38 = vsel %vm817_vm11, 1, %v2259_v1 }
  0x29   : > { %vm915_vm12 = vcmp.eq.s32.totalorder %v424_v3, %v2424_v24  ;;  %vm916_vm13 = vcmp.eq.s32.totalorder %v425_v4, %v2424_v24  ;;  %vm1014_vm14 = vcmp.eq.s32.totalorder %v424_v3, %v2426_v25  ;;  %vm1015_vm15 = vcmp.eq.s32.totalorder %v425_v4, %v2426_v25 }
  0x2a   : > { %v783_v39 = vadd.s32 %v751_v33, %v686_v35  ;;  %v784_v40 = vadd.s32 %v752_v34, %v687_v36  ;;  %v947_v41 = vsel %vm915_vm12, 1, %v2259_v1  ;;  %v948_v42 = vsel %vm916_vm13, 1, %v2259_v1 }
  0x2b   : > { %v1046_v43 = vsel %vm1014_vm14, 1, %v2259_v1  ;;  %v1047_v44 = vsel %vm1015_vm15, 1, %v2259_v1  ;;  %v507_v45 = vsel %vm475_vm3, 1, %v2259_v1  ;;  %vm541_vm0 = vcmp.eq.s32.totalorder %v2381_v5, %v2416_v20 }
  0x2c   : > { %v880_v46 = vadd.s32 %v848_v37, %v783_v39  ;;  %v881_v47 = vadd.s32 %v849_v38, %v784_v40  ;;  %vm542_vm1 = vcmp.eq.s32.totalorder %v2384_v6, %v2416_v20  ;;  %v573_v48 = vsel %vm541_vm0, 1, %v2259_v1 }
  0x2d   : > { %v574_v49 = vsel %vm542_vm1, 1, %v2259_v1  ;;  %v605_v50 = vadd.s32 %v573_v48, %v506_v26  ;;  %vm638_vm2 = vcmp.eq.s32.totalorder %v2381_v5, %v2418_v21  ;;  %vm639_vm4 = vcmp.eq.s32.totalorder %v2384_v6, %v2418_v21 }
  0x2e   : > { %v979_v51 = vadd.s32 %v947_v41, %v880_v46  ;;  %v980_v52 = vadd.s32 %v948_v42, %v881_v47  ;;  %v606_v53 = vadd.s32 %v574_v49, %v507_v45  ;;  %v670_v54 = vsel %vm638_vm2, 1, %v2259_v1 }
  0x2f   : > { %v671_v55 = vsel %vm639_vm4, 1, %v2259_v1  ;;  %v702_v56 = vadd.s32 %v670_v54, %v605_v50  ;;  %vm735_vm3 = vcmp.eq.s32.totalorder %v2381_v5, %v2420_v22  ;;  %vm736_vm5 = vcmp.eq.s32.totalorder %v2384_v6, %v2420_v22 }
  0x30   : > { %v1078_v57 = vadd.s32 %v1046_v43, %v979_v51  ;;  %v1079_v58 = vadd.s32 %v1047_v44, %v980_v52  ;;  %v703_v59 = vadd.s32 %v671_v55, %v606_v53  ;;  %v767_v60 = vsel %vm735_vm3, 1, %v2259_v1 }
  0x31   : > { %v768_v61 = vsel %vm736_vm5, 1, %v2259_v1  ;;  %v799_v62 = vadd.s32 %v767_v60, %v702_v56  ;;  %vm832_vm6 = vcmp.eq.s32.totalorder %v2381_v5, %v2422_v23  ;;  %vm833_vm7 = vcmp.eq.s32.totalorder %v2384_v6, %v2422_v23 }
  0x32   : > { %v1110_v63 = vcvt.s32.f32 %v1078_v57  ;;  %v1111_v0 = vcvt.s32.f32 %v1079_v58  ;;  %v800_v3 = vadd.s32 %v768_v61, %v703_v59  ;;  %v864_v4 = vsel %vm832_vm6, 1, %v2259_v1 }
  0x33   : > { %v865_v10 = vsel %vm833_vm7, 1, %v2259_v1  ;;  %v896_v11 = vadd.s32 %v864_v4, %v799_v62  ;;  %vm931_vm8 = vcmp.eq.s32.totalorder %v2381_v5, %v2424_v24  ;;  %vm932_vm9 = vcmp.eq.s32.totalorder %v2384_v6, %v2424_v24 }
  0x34   : > { %v1135_v14 = vpack.c.bf16 %v1111_v0, %v1110_v63  ;;  %v897_v15 = vadd.s32 %v865_v10, %v800_v3  ;;  %v963_v16 = vsel %vm931_vm8, 1, %v2259_v1  ;;  %v964_v17 = vsel %vm932_vm9, 1, %v2259_v1 }
  0x35   : > { %v995_v18 = vadd.s32 %v963_v16, %v896_v11  ;;  %vm1030_vm10 = vcmp.eq.s32.totalorder %v2381_v5, %v2426_v25  ;;  %vm1031_vm11 = vcmp.eq.s32.totalorder %v2384_v6, %v2426_v25  ;;  %vm456_vm12 = vcmp.eq.s32.totalorder %v2396_v8, %v2393_v7 }
  0x36   : > { %1168 = vmatpush.bf16.msra.mxu0 %v1135_v14  ;;  %v996_v19 = vadd.s32 %v964_v17, %v897_v15  ;;  %v1062_v26 = vsel %vm1030_vm10, 1, %v2259_v1  ;;  %v1063_v27 = vsel %vm1031_vm11, 1, %v2259_v1  ;;  %vm457_vm13 = vcmp.eq.s32.totalorder %v2399_v9, %v2393_v7 }
  0x37   : > { %v1094_v28 = vadd.s32 %v1062_v26, %v995_v18  ;;  %v488_v29 = vsel %vm456_vm12, 1, %v2259_v1  ;;  %v489_v5 = vsel %vm457_vm13, 1, %v2259_v1  ;;  %vm523_vm14 = vcmp.eq.s32.totalorder %v2396_v8, %v2416_v20 }
  0x38   : > { %v1095_v6 = vadd.s32 %v1063_v27, %v996_v19  ;;  %vm524_vm15 = vcmp.eq.s32.totalorder %v2399_v9, %v2416_v20  ;;  %v555_v30 = vsel %vm523_vm14, 1, %v2259_v1  ;;  %vm620_vm0 = vcmp.eq.s32.totalorder %v2396_v8, %v2418_v21 }
  0x39   : > { %v1126_v31 = vcvt.s32.f32 %v1094_v28  ;;  %v556_v32 = vsel %vm524_vm15, 1, %v2259_v1  ;;  %v587_v33 = vadd.s32 %v555_v30, %v488_v29  ;;  %vm621_vm1 = vcmp.eq.s32.totalorder %v2399_v9, %v2418_v21 }
  0x3a   : > { %v1127_v34 = vcvt.s32.f32 %v1095_v6  ;;  %v588_v35 = vadd.s32 %v556_v32, %v489_v5  ;;  %v652_v36 = vsel %vm620_vm0, 1, %v2259_v1  ;;  %v653_v37 = vsel %vm621_vm1, 1, %v2259_v1 }
  0x3b   : > { %v684_v38 = vadd.s32 %v652_v36, %v587_v33  ;;  %vm717_vm2 = vcmp.eq.s32.totalorder %v2396_v8, %v2420_v22  ;;  %vm718_vm4 = vcmp.eq.s32.totalorder %v2399_v9, %v2420_v22  ;;  %vm814_vm3 = vcmp.eq.s32.totalorder %v2396_v8, %v2422_v23 }
  0x3c   : > { %v1143_v39 = vpack.c.bf16 %v1127_v34, %v1126_v31  ;;  %v685_v40 = vadd.s32 %v653_v37, %v588_v35  ;;  %v749_v41 = vsel %vm717_vm2, 1, %v2259_v1  ;;  %v750_v42 = vsel %vm718_vm4, 1, %v2259_v1 }
  0x3d   : > { %v781_v43 = vadd.s32 %v749_v41, %v684_v38  ;;  %vm815_vm5 = vcmp.eq.s32.totalorder %v2399_v9, %v2422_v23  ;;  %v846_v44 = vsel %vm814_vm3, 1, %v2259_v1  ;;  %vm913_vm6 = vcmp.eq.s32.totalorder %v2396_v8, %v2424_v24 }
  0x3e   : > { %1187 = vmatpush.bf16.msra.mxu1 %v1143_v39  ;;  %v782_v45 = vadd.s32 %v750_v42, %v685_v40  ;;  %v847_v46 = vsel %vm815_vm5, 1, %v2259_v1  ;;  %vm914_vm7 = vcmp.eq.s32.totalorder %v2399_v9, %v2424_v24  ;;  %v945_v47 = vsel %vm913_vm6, 1, %v2259_v1 }
  0x3f   : > { %v878_v48 = vadd.s32 %v846_v44, %v781_v43  ;;  %v946_v49 = vsel %vm914_vm7, 1, %v2259_v1  ;;  %vm1012_vm8 = vcmp.eq.s32.totalorder %v2396_v8, %v2426_v25  ;;  %vm1013_vm9 = vcmp.eq.s32.totalorder %v2399_v9, %v2426_v25 }
  0x40   : > { %v879_v50 = vadd.s32 %v847_v46, %v782_v45  ;;  %v1044_v51 = vsel %vm1012_vm8, 1, %v2259_v1  ;;  %v1045_v52 = vsel %vm1013_vm9, 1, %v2259_v1  ;;  %vm472_vm10 = vcmp.eq.s32.totalorder %v2405_v12, %v2393_v7 }
  0x41   : > { %v977_v53 = vadd.s32 %v945_v47, %v878_v48  ;;  %vm473_vm11 = vcmp.eq.s32.totalorder %v2408_v13, %v2393_v7  ;;  %v504_v54 = vsel %vm472_vm10, 1, %v2259_v1  ;;  %vm539_vm12 = vcmp.eq.s32.totalorder %v2405_v12, %v2416_v20 }
  0x42   : > { %v978_v8 = vadd.s32 %v946_v49, %v879_v50  ;;  %v505_v9 = vsel %vm473_vm11, 1, %v2259_v1  ;;  %vm540_vm13 = vcmp.eq.s32.totalorder %v2408_v13, %v2416_v20  ;;  %v571_v55 = vsel %vm539_vm12, 1, %v2259_v1 }
  0x43   : > { %v1076_v56 = vadd.s32 %v1044_v51, %v977_v53  ;;  %v572_v57 = vsel %vm540_vm13, 1, %v2259_v1  ;;  %v603_v58 = vadd.s32 %v571_v55, %v504_v54  ;;  %vm636_vm14 = vcmp.eq.s32.totalorder %v2405_v12, %v2418_v21 }
  0x44   : > { %v1077_v59 = vadd.s32 %v1045_v52, %v978_v8  ;;  %v604_v60 = vadd.s32 %v572_v57, %v505_v9  ;;  %vm637_vm15 = vcmp.eq.s32.totalorder %v2408_v13, %v2418_v21  ;;  %v668_v61 = vsel %vm636_vm14, 1, %v2259_v1 }
  0x45   : > { %v1108_v62 = vcvt.s32.f32 %v1076_v56  ;;  %v669_v63 = vsel %vm637_vm15, 1, %v2259_v1  ;;  %v700_v0 = vadd.s32 %v668_v61, %v603_v58  ;;  %vm733_vm0 = vcmp.eq.s32.totalorder %v2405_v12, %v2420_v22 }
  0x46   : > { %v1109_v3 = vcvt.s32.f32 %v1077_v59  ;;  %v701_v4 = vadd.s32 %v669_v63, %v604_v60  ;;  %vm734_vm1 = vcmp.eq.s32.totalorder %v2408_v13, %v2420_v22  ;;  %v765_v10 = vsel %vm733_vm0, 1, %v2259_v1 }
  0x47   : > { %v766_v11 = vsel %vm734_vm1, 1, %v2259_v1  ;;  %v797_v14 = vadd.s32 %v765_v10, %v700_v0  ;;  %vm830_vm2 = vcmp.eq.s32.totalorder %v2405_v12, %v2422_v23  ;;  %vm831_vm4 = vcmp.eq.s32.totalorder %v2408_v13, %v2422_v23 }
  0x48   : > { %v1134_v15 = vpack.c.bf16 %v1109_v3, %v1108_v62  ;;  %v798_v16 = vadd.s32 %v766_v11, %v701_v4  ;;  %v862_v17 = vsel %vm830_vm2, 1, %v2259_v1  ;;  %v863_v18 = vsel %vm831_vm4, 1, %v2259_v1 }
  0x49   : > { %v894_v19 = vadd.s32 %v862_v17, %v797_v14  ;;  %vm929_vm3 = vcmp.eq.s32.totalorder %v2405_v12, %v2424_v24  ;;  %vm930_vm5 = vcmp.eq.s32.totalorder %v2408_v13, %v2424_v24  ;;  %vm1028_vm6 = vcmp.eq.s32.totalorder %v2405_v12, %v2426_v25 }
  0x4a   : > { %1169 = vmatpush.bf16.msra.mxu0 %v1134_v15  ;;  %v895_v26 = vadd.s32 %v863_v18, %v798_v16  ;;  %v961_v27 = vsel %vm929_vm3, 1, %v2259_v1  ;;  %v962_v28 = vsel %vm930_vm5, 1, %v2259_v1  ;;  %vm1029_vm7 = vcmp.eq.s32.totalorder %v2408_v13, %v2426_v25 }
  0x4b   : > { %v993_v29 = vadd.s32 %v961_v27, %v894_v19  ;;  %v1060_v5 = vsel %vm1028_vm6, 1, %v2259_v1  ;;  %v1061_v6 = vsel %vm1029_vm7, 1, %v2259_v1  ;;  %v420_v30 = vadd.s32 80, %v2370_v2 }
  0x4c   : > { %v994_v31 = vadd.s32 %v962_v28, %v895_v26  ;;  %v421_v32 = vadd.s32 88, %v2370_v2  ;;  %v2582_v12 = vadd.s32 208, %v2370_v2  ;;  %v2585_v33 = vadd.s32 216, %v2370_v2 }
  0x4d   : > { %v1092_v34 = vadd.s32 %v1060_v5, %v993_v29  ;;  %vm454_vm8 = vcmp.eq.s32.totalorder %v420_v30, %v2393_v7  ;;  %vm521_vm9 = vcmp.eq.s32.totalorder %v420_v30, %v2416_v20  ;;  %vm618_vm10 = vcmp.eq.s32.totalorder %v420_v30, %v2418_v21 }
  0x4e   : > { %v1093_v13 = vadd.s32 %v1061_v6, %v994_v31  ;;  %vm455_vm11 = vcmp.eq.s32.totalorder %v421_v32, %v2393_v7  ;;  %v486_v35 = vsel %vm454_vm8, 1, %v2259_v1  ;;  %vm522_vm12 = vcmp.eq.s32.totalorder %v421_v32, %v2416_v20 }
  0x4f   : > { %v1124_v36 = vcvt.s32.f32 %v1092_v34  ;;  %v487_v37 = vsel %vm455_vm11, 1, %v2259_v1  ;;  %v553_v38 = vsel %vm521_vm9, 1, %v2259_v1  ;;  %v554_v39 = vsel %vm522_vm12, 1, %v2259_v1 }
  0x50   : > { %v1125_v40 = vcvt.s32.f32 %v1093_v13  ;;  %v585_v41 = vadd.s32 %v553_v38, %v486_v35  ;;  %v586_v42 = vadd.s32 %v554_v39, %v487_v37  ;;  %vm619_vm13 = vcmp.eq.s32.totalorder %v421_v32, %v2418_v21 }
  0x51   : > { %v650_v43 = vsel %vm618_vm10, 1, %v2259_v1  ;;  %v651_v44 = vsel %vm619_vm13, 1, %v2259_v1  ;;  %vm715_vm14 = vcmp.eq.s32.totalorder %v420_v30, %v2420_v22  ;;  %vm716_vm15 = vcmp.eq.s32.totalorder %v421_v32, %v2420_v22 }
  0x52   : > { %v1142_v45 = vpack.c.bf16 %v1125_v40, %v1124_v36  ;;  %v682_v46 = vadd.s32 %v650_v43, %v585_v41  ;;  %v683_v47 = vadd.s32 %v651_v44, %v586_v42  ;;  %v747_v48 = vsel %vm715_vm14, 1, %v2259_v1 }
  0x53   : > { %v748_v49 = vsel %vm716_vm15, 1, %v2259_v1  ;;  %vm812_vm0 = vcmp.eq.s32.totalorder %v420_v30, %v2422_v23  ;;  %vm813_vm1 = vcmp.eq.s32.totalorder %v421_v32, %v2422_v23  ;;  %vm911_vm2 = vcmp.eq.s32.totalorder %v420_v30, %v2424_v24 }
  0x54   : > { %1188 = vmatpush.bf16.msra.mxu1 %v1142_v45  ;;  %v779_v50 = vadd.s32 %v747_v48, %v682_v46  ;;  %v780_v51 = vadd.s32 %v748_v49, %v683_v47  ;;  %v844_v52 = vsel %vm812_vm0, 1, %v2259_v1  ;;  %v845_v53 = vsel %vm813_vm1, 1, %v2259_v1 }
  0x55   : > { %vm912_vm4 = vcmp.eq.s32.totalorder %v421_v32, %v2424_v24  ;;  %v943_v54 = vsel %vm911_vm2, 1, %v2259_v1  ;;  %vm1010_vm3 = vcmp.eq.s32.totalorder %v420_v30, %v2426_v25  ;;  %vm1011_vm5 = vcmp.eq.s32.totalorder %v421_v32, %v2426_v25 }
  0x56   : > { %v876_v8 = vadd.s32 %v844_v52, %v779_v50  ;;  %v877_v9 = vadd.s32 %v845_v53, %v780_v51  ;;  %v944_v55 = vsel %vm912_vm4, 1, %v2259_v1  ;;  %v1042_v56 = vsel %vm1010_vm3, 1, %v2259_v1 }
  0x57   : > { %v1043_v57 = vsel %vm1011_vm5, 1, %v2259_v1  ;;  %vm470_vm6 = vcmp.eq.s32.totalorder %v2582_v12, %v2393_v7  ;;  %vm471_vm7 = vcmp.eq.s32.totalorder %v2585_v33, %v2393_v7  ;;  %vm537_vm8 = vcmp.eq.s32.totalorder %v2582_v12, %v2416_v20 }
  0x58   : > { %v975_v58 = vadd.s32 %v943_v54, %v876_v8  ;;  %v976_v59 = vadd.s32 %v944_v55, %v877_v9  ;;  %v502_v60 = vsel %vm470_vm6, 1, %v2259_v1  ;;  %v503_v61 = vsel %vm471_vm7, 1, %v2259_v1 }
  0x59   : > { %vm538_vm9 = vcmp.eq.s32.totalorder %v2585_v33, %v2416_v20  ;;  %v569_v62 = vsel %vm537_vm8, 1, %v2259_v1  ;;  %vm634_vm10 = vcmp.eq.s32.totalorder %v2582_v12, %v2418_v21  ;;  %vm635_vm11 = vcmp.eq.s32.totalorder %v2585_v33, %v2418_v21 }
  0x5a   : > { %v1074_v63 = vadd.s32 %v1042_v56, %v975_v58  ;;  %v1075_v0 = vadd.s32 %v1043_v57, %v976_v59  ;;  %v570_v3 = vsel %vm538_vm9, 1, %v2259_v1  ;;  %v601_v4 = vadd.s32 %v569_v62, %v502_v60 }
  0x5b   : > { %v602_v10 = vadd.s32 %v570_v3, %v503_v61  ;;  %v666_v11 = vsel %vm634_vm10, 1, %v2259_v1  ;;  %v667_v14 = vsel %vm635_vm11, 1, %v2259_v1  ;;  %vm731_vm12 = vcmp.eq.s32.totalorder %v2582_v12, %v2420_v22 }
  0x5c   : > { %v1106_v15 = vcvt.s32.f32 %v1074_v63  ;;  %v1107_v16 = vcvt.s32.f32 %v1075_v0  ;;  %v698_v17 = vadd.s32 %v666_v11, %v601_v4  ;;  %vm732_vm13 = vcmp.eq.s32.totalorder %v2585_v33, %v2420_v22 }
  0x5d   : > { %v699_v18 = vadd.s32 %v667_v14, %v602_v10  ;;  %v763_v19 = vsel %vm731_vm12, 1, %v2259_v1  ;;  %v764_v26 = vsel %vm732_vm13, 1, %v2259_v1  ;;  %vm828_vm14 = vcmp.eq.s32.totalorder %v2582_v12, %v2422_v23 }
  0x5e   : > { %v1133_v27 = vpack.c.bf16 %v1107_v16, %v1106_v15  ;;  %v795_v28 = vadd.s32 %v763_v19, %v698_v17  ;;  %vm829_vm15 = vcmp.eq.s32.totalorder %v2585_v33, %v2422_v23  ;;  %v860_v29 = vsel %vm828_vm14, 1, %v2259_v1 }
  0x5f   : > { %v796_v5 = vadd.s32 %v764_v26, %v699_v18  ;;  %v861_v6 = vsel %vm829_vm15, 1, %v2259_v1  ;;  %vm927_vm0 = vcmp.eq.s32.totalorder %v2582_v12, %v2424_v24  ;;  %vm928_vm1 = vcmp.eq.s32.totalorder %v2585_v33, %v2424_v24 }
  0x60   : > { %1170 = vmatpush.bf16.msra.mxu0 %v1133_v27  ;;  %v892_v30 = vadd.s32 %v860_v29, %v795_v28  ;;  %v959_v31 = vsel %vm927_vm0, 1, %v2259_v1  ;;  %v960_v32 = vsel %vm928_vm1, 1, %v2259_v1  ;;  %vm1026_vm2 = vcmp.eq.s32.totalorder %v2582_v12, %v2426_v25 }
  0x61   : > { %v893_v34 = vadd.s32 %v861_v6, %v796_v5  ;;  %vm1027_vm4 = vcmp.eq.s32.totalorder %v2585_v33, %v2426_v25  ;;  %v1058_v13 = vsel %vm1026_vm2, 1, %v2259_v1  ;;  %v418_v35 = vadd.s32 64, %v2370_v2 }
  0x62   : > { %v991_v36 = vadd.s32 %v959_v31, %v892_v30  ;;  %v1059_v37 = vsel %vm1027_vm4, 1, %v2259_v1  ;;  %v419_v38 = vadd.s32 72, %v2370_v2  ;;  %v2660_v39 = vadd.s32 192, %v2370_v2 }
  0x63   : > { %v992_v40 = vadd.s32 %v960_v32, %v893_v34  ;;  %vm452_vm3 = vcmp.eq.s32.totalorder %v418_v35, %v2393_v7  ;;  %vm519_vm5 = vcmp.eq.s32.totalorder %v418_v35, %v2416_v20  ;;  %vm616_vm6 = vcmp.eq.s32.totalorder %v418_v35, %v2418_v21 }
  0x64   : > { %v1090_v12 = vadd.s32 %v1058_v13, %v991_v36  ;;  %vm453_vm7 = vcmp.eq.s32.totalorder %v419_v38, %v2393_v7  ;;  %v484_v33 = vsel %vm452_vm3, 1, %v2259_v1  ;;  %vm520_vm8 = vcmp.eq.s32.totalorder %v419_v38, %v2416_v20 }
  0x65   : > { %v1091_v41 = vadd.s32 %v1059_v37, %v992_v40  ;;  %v485_v42 = vsel %vm453_vm7, 1, %v2259_v1  ;;  %v551_v43 = vsel %vm519_vm5, 1, %v2259_v1  ;;  %v552_v44 = vsel %vm520_vm8, 1, %v2259_v1 }
  0x66   : > { %v1122_v45 = vcvt.s32.f32 %v1090_v12  ;;  %v583_v46 = vadd.s32 %v551_v43, %v484_v33  ;;  %v584_v47 = vadd.s32 %v552_v44, %v485_v42  ;;  %vm617_vm9 = vcmp.eq.s32.totalorder %v419_v38, %v2418_v21 }
  0x67   : > { %v1123_v48 = vcvt.s32.f32 %v1091_v41  ;;  %v648_v49 = vsel %vm616_vm6, 1, %v2259_v1  ;;  %v649_v50 = vsel %vm617_vm9, 1, %v2259_v1  ;;  %vm713_vm10 = vcmp.eq.s32.totalorder %v418_v35, %v2420_v22 }
  0x68   : > { %v680_v51 = vadd.s32 %v648_v49, %v583_v46  ;;  %v681_v52 = vadd.s32 %v649_v50, %v584_v47  ;;  %vm714_vm11 = vcmp.eq.s32.totalorder %v419_v38, %v2420_v22  ;;  %v745_v53 = vsel %vm713_vm10, 1, %v2259_v1 }
  0x69   : > { %v1141_v54 = vpack.c.bf16 %v1123_v48, %v1122_v45  ;;  %v746_v8 = vsel %vm714_vm11, 1, %v2259_v1  ;;  %vm810_vm12 = vcmp.eq.s32.totalorder %v418_v35, %v2422_v23  ;;  %vm811_vm13 = vcmp.eq.s32.totalorder %v419_v38, %v2422_v23 }
  0x6a   : > { %v777_v9 = vadd.s32 %v745_v53, %v680_v51  ;;  %v778_v55 = vadd.s32 %v746_v8, %v681_v52  ;;  %v842_v56 = vsel %vm810_vm12, 1, %v2259_v1  ;;  %v843_v57 = vsel %vm811_vm13, 1, %v2259_v1 }
  0x6b   : > { %1189 = vmatpush.bf16.msra.mxu1 %v1141_v54  ;;  %vm909_vm14 = vcmp.eq.s32.totalorder %v418_v35, %v2424_v24  ;;  %vm910_vm15 = vcmp.eq.s32.totalorder %v419_v38, %v2424_v24  ;;  %vm1008_vm0 = vcmp.eq.s32.totalorder %v418_v35, %v2426_v25  ;;  %vm1009_vm1 = vcmp.eq.s32.totalorder %v419_v38, %v2426_v25 }
  0x6c   : > { %v874_v58 = vadd.s32 %v842_v56, %v777_v9  ;;  %v875_v59 = vadd.s32 %v843_v57, %v778_v55  ;;  %v941_v60 = vsel %vm909_vm14, 1, %v2259_v1  ;;  %v942_v61 = vsel %vm910_vm15, 1, %v2259_v1 }
  0x6d   : > { %v1040_v62 = vsel %vm1008_vm0, 1, %v2259_v1  ;;  %v1041_v63 = vsel %vm1009_vm1, 1, %v2259_v1  ;;  %v435_v0 = vadd.s32 200, %v2370_v2  ;;  %vm468_vm2 = vcmp.eq.s32.totalorder %v2660_v39, %v2393_v7 }
  0x6e   : > { %v973_v3 = vadd.s32 %v941_v60, %v874_v58  ;;  %v974_v4 = vadd.s32 %v942_v61, %v875_v59  ;;  %v500_v10 = vsel %vm468_vm2, 1, %v2259_v1  ;;  %vm535_vm4 = vcmp.eq.s32.totalorder %v2660_v39, %v2416_v20 }
  0x6f   : > { %vm469_vm3 = vcmp.eq.s32.totalorder %v435_v0, %v2393_v7  ;;  %vm536_vm5 = vcmp.eq.s32.totalorder %v435_v0, %v2416_v20  ;;  %v567_v11 = vsel %vm535_vm4, 1, %v2259_v1  ;;  %vm632_vm6 = vcmp.eq.s32.totalorder %v2660_v39, %v2418_v21 }
  0x70   : > { %v1072_v14 = vadd.s32 %v1040_v62, %v973_v3  ;;  %v1073_v15 = vadd.s32 %v1041_v63, %v974_v4  ;;  %v501_v16 = vsel %vm469_vm3, 1, %v2259_v1  ;;  %v568_v17 = vsel %vm536_vm5, 1, %v2259_v1 }
  0x71   : > { %v599_v18 = vadd.s32 %v567_v11, %v500_v10  ;;  %v600_v19 = vadd.s32 %v568_v17, %v501_v16  ;;  %vm633_vm7 = vcmp.eq.s32.totalorder %v435_v0, %v2418_v21  ;;  %v664_v26 = vsel %vm632_vm6, 1, %v2259_v1 }
  0x72   : > { %v1104_v27 = vcvt.s32.f32 %v1072_v14  ;;  %v1105_v28 = vcvt.s32.f32 %v1073_v15  ;;  %v665_v29 = vsel %vm633_vm7, 1, %v2259_v1  ;;  %vm729_vm8 = vcmp.eq.s32.totalorder %v2660_v39, %v2420_v22 }
  0x73   : > { %v696_v5 = vadd.s32 %v664_v26, %v599_v18  ;;  %v697_v6 = vadd.s32 %v665_v29, %v600_v19  ;;  %vm730_vm9 = vcmp.eq.s32.totalorder %v435_v0, %v2420_v22  ;;  %v761_v30 = vsel %vm729_vm8, 1, %v2259_v1 }
  0x74   : > { %v1132_v31 = vpack.c.bf16 %v1105_v28, %v1104_v27  ;;  %v762_v32 = vsel %vm730_vm9, 1, %v2259_v1  ;;  %vm826_vm10 = vcmp.eq.s32.totalorder %v2660_v39, %v2422_v23  ;;  %vm827_vm11 = vcmp.eq.s32.totalorder %v435_v0, %v2422_v23 }
  0x75   : > { %v793_v34 = vadd.s32 %v761_v30, %v696_v5  ;;  %v794_v13 = vadd.s32 %v762_v32, %v697_v6  ;;  %v858_v35 = vsel %vm826_vm10, 1, %v2259_v1  ;;  %v859_v36 = vsel %vm827_vm11, 1, %v2259_v1 }
  0x76   : > { %1171 = vmatpush.bf16.msra.mxu0 %v1132_v31  ;;  %vm925_vm12 = vcmp.eq.s32.totalorder %v2660_v39, %v2424_v24  ;;  %vm926_vm13 = vcmp.eq.s32.totalorder %v435_v0, %v2424_v24  ;;  %vm1024_vm14 = vcmp.eq.s32.totalorder %v2660_v39, %v2426_v25  ;;  %vm1025_vm15 = vcmp.eq.s32.totalorder %v435_v0, %v2426_v25 }
  0x77   : > { %v890_v37 = vadd.s32 %v858_v35, %v793_v34  ;;  %v891_v38 = vadd.s32 %v859_v36, %v794_v13  ;;  %v957_v40 = vsel %vm925_vm12, 1, %v2259_v1  ;;  %v958_v12 = vsel %vm926_vm13, 1, %v2259_v1 }
  0x78   : > { %v1056_v33 = vsel %vm1024_vm14, 1, %v2259_v1  ;;  %v1057_v41 = vsel %vm1025_vm15, 1, %v2259_v1  ;;  %v416_v42 = vadd.s32 48, %v2370_v2  ;;  %v417_v43 = vadd.s32 56, %v2370_v2 }
  0x79   : > { %v989_v44 = vadd.s32 %v957_v40, %v890_v37  ;;  %v990_v45 = vadd.s32 %v958_v12, %v891_v38  ;;  %v2729_v39 = vadd.s32 176, %v2370_v2  ;;  %v2732_v46 = vadd.s32 184, %v2370_v2 }
  0x7a   : > { %vm450_vm0 = vcmp.eq.s32.totalorder %v416_v42, %v2393_v7  ;;  %vm451_vm1 = vcmp.eq.s32.totalorder %v417_v43, %v2393_v7  ;;  %vm517_vm2 = vcmp.eq.s32.totalorder %v416_v42, %v2416_v20  ;;  %vm518_vm4 = vcmp.eq.s32.totalorder %v417_v43, %v2416_v20 }
  0x7b   : > { %v1088_v47 = vadd.s32 %v1056_v33, %v989_v44  ;;  %v1089_v48 = vadd.s32 %v1057_v41, %v990_v45  ;;  %v482_v49 = vsel %vm450_vm0, 1, %v2259_v1  ;;  %v483_v50 = vsel %vm451_vm1, 1, %v2259_v1 }
  0x7c   : > { %v549_v51 = vsel %vm517_vm2, 1, %v2259_v1  ;;  %v550_v52 = vsel %vm518_vm4, 1, %v2259_v1  ;;  %vm614_vm3 = vcmp.eq.s32.totalorder %v416_v42, %v2418_v21  ;;  %vm615_vm5 = vcmp.eq.s32.totalorder %v417_v43, %v2418_v21 }
  0x7d   : > { %v1120_v53 = vcvt.s32.f32 %v1088_v47  ;;  %v1121_v54 = vcvt.s32.f32 %v1089_v48  ;;  %v581_v8 = vadd.s32 %v549_v51, %v482_v49  ;;  %v582_v9 = vadd.s32 %v550_v52, %v483_v50 }
  0x7e   : > { %v646_v55 = vsel %vm614_vm3, 1, %v2259_v1  ;;  %v647_v56 = vsel %vm615_vm5, 1, %v2259_v1  ;;  %vm711_vm6 = vcmp.eq.s32.totalorder %v416_v42, %v2420_v22  ;;  %vm712_vm7 = vcmp.eq.s32.totalorder %v417_v43, %v2420_v22 }
  0x7f   : > { %v1140_v57 = vpack.c.bf16 %v1121_v54, %v1120_v53  ;;  %v678_v58 = vadd.s32 %v646_v55, %v581_v8  ;;  %v679_v59 = vadd.s32 %v647_v56, %v582_v9  ;;  %v743_v60 = vsel %vm711_vm6, 1, %v2259_v1 }
  0x80   : > { %v744_v61 = vsel %vm712_vm7, 1, %v2259_v1  ;;  %vm808_vm8 = vcmp.eq.s32.totalorder %v416_v42, %v2422_v23  ;;  %vm809_vm9 = vcmp.eq.s32.totalorder %v417_v43, %v2422_v23  ;;  %vm907_vm10 = vcmp.eq.s32.totalorder %v416_v42, %v2424_v24 }
  0x81   : > { %1190 = vmatpush.bf16.msra.mxu1 %v1140_v57  ;;  %v775_v62 = vadd.s32 %v743_v60, %v678_v58  ;;  %v776_v63 = vadd.s32 %v744_v61, %v679_v59  ;;  %v840_v0 = vsel %vm808_vm8, 1, %v2259_v1  ;;  %v841_v3 = vsel %vm809_vm9, 1, %v2259_v1 }
  0x82   : > { %vm908_vm11 = vcmp.eq.s32.totalorder %v417_v43, %v2424_v24  ;;  %v939_v4 = vsel %vm907_vm10, 1, %v2259_v1  ;;  %vm1006_vm12 = vcmp.eq.s32.totalorder %v416_v42, %v2426_v25  ;;  %vm1007_vm13 = vcmp.eq.s32.totalorder %v417_v43, %v2426_v25 }
  0x83   : > { %v872_v10 = vadd.s32 %v840_v0, %v775_v62  ;;  %v873_v11 = vadd.s32 %v841_v3, %v776_v63  ;;  %v940_v14 = vsel %vm908_vm11, 1, %v2259_v1  ;;  %v1038_v15 = vsel %vm1006_vm12, 1, %v2259_v1 }
  0x84   : > { %v1039_v16 = vsel %vm1007_vm13, 1, %v2259_v1  ;;  %vm466_vm14 = vcmp.eq.s32.totalorder %v2729_v39, %v2393_v7  ;;  %vm467_vm15 = vcmp.eq.s32.totalorder %v2732_v46, %v2393_v7  ;;  %vm533_vm0 = vcmp.eq.s32.totalorder %v2729_v39, %v2416_v20 }
  0x85   : > { %v971_v17 = vadd.s32 %v939_v4, %v872_v10  ;;  %v972_v18 = vadd.s32 %v940_v14, %v873_v11  ;;  %v498_v19 = vsel %vm466_vm14, 1, %v2259_v1  ;;  %v499_v26 = vsel %vm467_vm15, 1, %v2259_v1 }
  0x86   : > { %vm534_vm1 = vcmp.eq.s32.totalorder %v2732_v46, %v2416_v20  ;;  %v565_v27 = vsel %vm533_vm0, 1, %v2259_v1  ;;  %vm630_vm2 = vcmp.eq.s32.totalorder %v2729_v39, %v2418_v21  ;;  %vm631_vm4 = vcmp.eq.s32.totalorder %v2732_v46, %v2418_v21 }
  0x87   : > { %v1070_v28 = vadd.s32 %v1038_v15, %v971_v17  ;;  %v1071_v29 = vadd.s32 %v1039_v16, %v972_v18  ;;  %v566_v5 = vsel %vm534_vm1, 1, %v2259_v1  ;;  %v597_v6 = vadd.s32 %v565_v27, %v498_v19 }
  0x88   : > { %v598_v30 = vadd.s32 %v566_v5, %v499_v26  ;;  %v662_v31 = vsel %vm630_vm2, 1, %v2259_v1  ;;  %v663_v32 = vsel %vm631_vm4, 1, %v2259_v1  ;;  %vm727_vm3 = vcmp.eq.s32.totalorder %v2729_v39, %v2420_v22 }
  0x89   : > { %v1102_v34 = vcvt.s32.f32 %v1070_v28  ;;  %v1103_v13 = vcvt.s32.f32 %v1071_v29  ;;  %v694_v35 = vadd.s32 %v662_v31, %v597_v6  ;;  %vm728_vm5 = vcmp.eq.s32.totalorder %v2732_v46, %v2420_v22  ;;  %v2844_v31 = vld [vmem:[%s2376_s28] ss:$0 sm:$0xff]  ;;  %s3184_s28 = scalar_lea.vmem [#allocation4], %s3292_s25  ;;  %s1810_s25 = sshll.u32 %s1807_s11, 4  ;;  %s1811_s25 = int_to_ptr.hbm [resolvable:$true] %s1810_s25 }
  0x8a   : > { %v695_v36 = vadd.s32 %v663_v32, %v598_v30  ;;  %v759_v37 = vsel %vm727_vm3, 1, %v2259_v1  ;;  %v760_v38 = vsel %vm728_vm5, 1, %v2259_v1  ;;  %vm824_vm6 = vcmp.eq.s32.totalorder %v2729_v39, %v2422_v23  ;;  %s1808_s26 = sshll.u32 %s3184_s28, 4  ;;  %s2177_s18 = sshra.s32 %s1811_s25, 4  ;;  %s1809_s26 = int_to_ptr.vmem [resolvable:$true] %s1808_s26  ;;  %s2178_s18 = int_to_ptr.hbm [resolvable:$true] %s2177_s18 }
  0x8b   : > { %v1131_v40 = vpack.c.bf16 %v1103_v13, %v1102_v34  ;;  %v791_v12 = vadd.s32 %v759_v37, %v694_v35  ;;  %vm825_vm7 = vcmp.eq.s32.totalorder %v2732_v46, %v2422_v23  ;;  %v856_v33 = vsel %vm824_vm6, 1, %v2259_v1  ;;  %s2179_s1 = scalar_lea.hbm %s2178_s18, 32  ;;  %p2184_p0 = scmp.lt.s32.totalorder %s2178_s18, %s3291_s10 }
  0x8c   : > { %v792_v41 = vadd.s32 %v760_v38, %v695_v36  ;;  %v857_v42 = vsel %vm825_vm7, 1, %v2259_v1  ;;  %vm923_vm8 = vcmp.eq.s32.totalorder %v2729_v39, %v2424_v24  ;;  %vm924_vm9 = vcmp.eq.s32.totalorder %v2732_v46, %v2424_v24  ;;  %p2180_p11 = scmp.ne.s32.totalorder %s2178_s18, %s2179_s1 }
  0x8d   : > { %1172 = vmatpush.bf16.msra.mxu0 %v1131_v40  ;;  %v888_v43 = vadd.s32 %v856_v33, %v791_v12  ;;  %v955_v44 = vsel %vm923_vm8, 1, %v2259_v1  ;;  %v956_v45 = vsel %vm924_vm9, 1, %v2259_v1  ;;  %vm1022_vm10 = vcmp.eq.s32.totalorder %v2729_v39, %v2426_v25 }
  0x8e   : > { %v889_v47 = vadd.s32 %v857_v42, %v792_v41  ;;  %vm1023_vm11 = vcmp.eq.s32.totalorder %v2732_v46, %v2426_v25  ;;  %v1054_v48 = vsel %vm1022_vm10, 1, %v2259_v1  ;;  %v414_v49 = vadd.s32 32, %v2370_v2  ;;  %p2181_p12 = pnand %p2180_p11, %p2356_p5 }
  0x8f   : > { %v987_v50 = vadd.s32 %v955_v44, %v888_v43  ;;  %v1055_v51 = vsel %vm1023_vm11, 1, %v2259_v1  ;;  %v415_v52 = vadd.s32 40, %v2370_v2  ;;  %v2807_v53 = vadd.s32 160, %v2370_v2 }
  0x90   : > { %v988_v54 = vadd.s32 %v956_v45, %v889_v47  ;;  %vm448_vm12 = vcmp.eq.s32.totalorder %v414_v49, %v2393_v7  ;;  %vm515_vm13 = vcmp.eq.s32.totalorder %v414_v49, %v2416_v20  ;;  %vm612_vm14 = vcmp.eq.s32.totalorder %v414_v49, %v2418_v21  ;;  %p2182_p13 = pneg %p2181_p12 }
  0x91   : > { %v1086_v39 = vadd.s32 %v1054_v48, %v987_v50  ;;  %vm449_vm15 = vcmp.eq.s32.totalorder %v415_v52, %v2393_v7  ;;  %v480_v46 = vsel %vm448_vm12, 1, %v2259_v1  ;;  %vm516_vm0 = vcmp.eq.s32.totalorder %v415_v52, %v2416_v20 }
  0x92   : > { %v1087_v8 = vadd.s32 %v1055_v51, %v988_v54  ;;  %v481_v9 = vsel %vm449_vm15, 1, %v2259_v1  ;;  %v547_v55 = vsel %vm515_vm13, 1, %v2259_v1  ;;  %v548_v56 = vsel %vm516_vm0, 1, %v2259_v1 }
  0x93   : > { %v1118_v57 = vcvt.s32.f32 %v1086_v39  ;;  %v579_v58 = vadd.s32 %v547_v55, %v480_v46  ;;  %v580_v59 = vadd.s32 %v548_v56, %v481_v9  ;;  %vm613_vm1 = vcmp.eq.s32.totalorder %v415_v52, %v2418_v21 }
  0x94   : > { %v1119_v60 = vcvt.s32.f32 %v1087_v8  ;;  %v644_v61 = vsel %vm612_vm14, 1, %v2259_v1  ;;  %v645_v62 = vsel %vm613_vm1, 1, %v2259_v1  ;;  %vm709_vm2 = vcmp.eq.s32.totalorder %v414_v49, %v2420_v22 }
  0x95   : > { %v676_v63 = vadd.s32 %v644_v61, %v579_v58  ;;  %v677_v0 = vadd.s32 %v645_v62, %v580_v59  ;;  %vm710_vm4 = vcmp.eq.s32.totalorder %v415_v52, %v2420_v22  ;;  %v741_v3 = vsel %vm709_vm2, 1, %v2259_v1 }
  0x96   : > { %v1139_v4 = vpack.c.bf16 %v1119_v60, %v1118_v57  ;;  %v742_v10 = vsel %vm710_vm4, 1, %v2259_v1  ;;  %vm806_vm3 = vcmp.eq.s32.totalorder %v414_v49, %v2422_v23  ;;  %vm807_vm5 = vcmp.eq.s32.totalorder %v415_v52, %v2422_v23 }
  0x97   : > { %v773_v11 = vadd.s32 %v741_v3, %v676_v63  ;;  %v774_v14 = vadd.s32 %v742_v10, %v677_v0  ;;  %v838_v15 = vsel %vm806_vm3, 1, %v2259_v1  ;;  %v839_v16 = vsel %vm807_vm5, 1, %v2259_v1 }
  0x98   : > { %1191 = vmatpush.bf16.msra.mxu1 %v1139_v4  ;;  %vm905_vm6 = vcmp.eq.s32.totalorder %v414_v49, %v2424_v24  ;;  %vm906_vm7 = vcmp.eq.s32.totalorder %v415_v52, %v2424_v24  ;;  %vm1004_vm8 = vcmp.eq.s32.totalorder %v414_v49, %v2426_v25  ;;  %vm1005_vm9 = vcmp.eq.s32.totalorder %v415_v52, %v2426_v25 }
  0x99   : > { %v870_v17 = vadd.s32 %v838_v15, %v773_v11  ;;  %v871_v18 = vadd.s32 %v839_v16, %v774_v14  ;;  %v937_v19 = vsel %vm905_vm6, 1, %v2259_v1  ;;  %v938_v26 = vsel %vm906_vm7, 1, %v2259_v1 }
  0x9a   : > { %v1036_v27 = vsel %vm1004_vm8, 1, %v2259_v1  ;;  %v1037_v28 = vsel %vm1005_vm9, 1, %v2259_v1  ;;  %v431_v29 = vadd.s32 168, %v2370_v2  ;;  %vm464_vm10 = vcmp.eq.s32.totalorder %v2807_v53, %v2393_v7 }
  0x9b   : > { %v969_v5 = vadd.s32 %v937_v19, %v870_v17  ;;  %v970_v6 = vadd.s32 %v938_v26, %v871_v18  ;;  %v496_v30 = vsel %vm464_vm10, 1, %v2259_v1  ;;  %vm531_vm11 = vcmp.eq.s32.totalorder %v2807_v53, %v2416_v20 }
  0x9c   : > { %vm465_vm12 = vcmp.eq.s32.totalorder %v431_v29, %v2844_v31  ;;  %vm532_vm13 = vcmp.eq.s32.totalorder %v431_v29, %v2416_v20  ;;  %v563_v32 = vsel %vm531_vm11, 1, %v2259_v1  ;;  %vm628_vm14 = vcmp.eq.s32.totalorder %v2807_v53, %v2418_v21 }
  0x9d   : > { %v1068_v34 = vadd.s32 %v1036_v27, %v969_v5  ;;  %v1069_v7 = vadd.s32 %v1037_v28, %v970_v6  ;;  %v497_v13 = vsel %vm465_vm12, 1, %v2259_v1  ;;  %v564_v35 = vsel %vm532_vm13, 1, %v2259_v1 }
  0x9e   : > { %v595_v36 = vadd.s32 %v563_v32, %v496_v30  ;;  %v596_v37 = vadd.s32 %v564_v35, %v497_v13  ;;  %vm629_vm15 = vcmp.eq.s32.totalorder %v431_v29, %v2418_v21  ;;  %v660_v38 = vsel %vm628_vm14, 1, %v2259_v1 }
  0x9f   : > { %v1100_v40 = vcvt.s32.f32 %v1068_v34  ;;  %v1101_v12 = vcvt.s32.f32 %v1069_v7  ;;  %v661_v33 = vsel %vm629_vm15, 1, %v2259_v1  ;;  %vm725_vm0 = vcmp.eq.s32.totalorder %v2807_v53, %v2420_v22 }
  0xa0   : > { %v692_v41 = vadd.s32 %v660_v38, %v595_v36  ;;  %v693_v42 = vadd.s32 %v661_v33, %v596_v37  ;;  %vm726_vm1 = vcmp.eq.s32.totalorder %v431_v29, %v2420_v22  ;;  %v757_v43 = vsel %vm725_vm0, 1, %v2259_v1 }
  0xa1   : > { %v1130_v44 = vpack.c.bf16 %v1101_v12, %v1100_v40  ;;  %v758_v45 = vsel %vm726_vm1, 1, %v2259_v1  ;;  %vm822_vm2 = vcmp.eq.s32.totalorder %v2807_v53, %v2422_v23  ;;  %vm823_vm4 = vcmp.eq.s32.totalorder %v431_v29, %v2422_v23 }
  0xa2   : > { %v789_v47 = vadd.s32 %v757_v43, %v692_v41  ;;  %v790_v48 = vadd.s32 %v758_v45, %v693_v42  ;;  %v854_v49 = vsel %vm822_vm2, 1, %v2259_v1  ;;  %v855_v50 = vsel %vm823_vm4, 1, %v2259_v1 }
  0xa3   : > { %1173 = vmatpush.bf16.msra.mxu0 %v1130_v44  ;;  %vm921_vm3 = vcmp.eq.s32.totalorder %v2807_v53, %v2424_v24  ;;  %vm922_vm5 = vcmp.eq.s32.totalorder %v431_v29, %v2424_v24  ;;  %vm1020_vm6 = vcmp.eq.s32.totalorder %v2807_v53, %v2426_v25  ;;  %vm1021_vm7 = vcmp.eq.s32.totalorder %v431_v29, %v2426_v25 }
  0xa4   : > { %v886_v51 = vadd.s32 %v854_v49, %v789_v47  ;;  %v887_v52 = vadd.s32 %v855_v50, %v790_v48  ;;  %v953_v54 = vsel %vm921_vm3, 1, %v2259_v1  ;;  %v954_v39 = vsel %vm922_vm5, 1, %v2259_v1 }
  0xa5   : > { %v1052_v46 = vsel %vm1020_vm6, 1, %v2259_v1  ;;  %v1053_v8 = vsel %vm1021_vm7, 1, %v2259_v1  ;;  %v412_v9 = vadd.s32 16, %v2370_v2  ;;  %v413_v55 = vadd.s32 24, %v2370_v2 }
  0xa6   : > { %v985_v56 = vadd.s32 %v953_v54, %v886_v51  ;;  %v986_v57 = vadd.s32 %v954_v39, %v887_v52  ;;  %v2879_v53 = vadd.s32 144, %v2370_v2  ;;  %v2882_v58 = vadd.s32 152, %v2370_v2 }
  0xa7   : > { %vm446_vm8 = vcmp.eq.s32.totalorder %v412_v9, %v2844_v31  ;;  %vm447_vm9 = vcmp.eq.s32.totalorder %v413_v55, %v2844_v31  ;;  %vm513_vm10 = vcmp.eq.s32.totalorder %v412_v9, %v2416_v20  ;;  %vm514_vm11 = vcmp.eq.s32.totalorder %v413_v55, %v2416_v20 }
  0xa8   : > { %v1084_v59 = vadd.s32 %v1052_v46, %v985_v56  ;;  %v1085_v60 = vadd.s32 %v1053_v8, %v986_v57  ;;  %v478_v61 = vsel %vm446_vm8, 1, %v2259_v1  ;;  %v479_v62 = vsel %vm447_vm9, 1, %v2259_v1 }
  0xa9   : > { %v545_v63 = vsel %vm513_vm10, 1, %v2259_v1  ;;  %v546_v0 = vsel %vm514_vm11, 1, %v2259_v1  ;;  %vm610_vm12 = vcmp.eq.s32.totalorder %v412_v9, %v2418_v21  ;;  %vm611_vm13 = vcmp.eq.s32.totalorder %v413_v55, %v2418_v21 }
  0xaa   : > { %v1116_v3 = vcvt.s32.f32 %v1084_v59  ;;  %v1117_v4 = vcvt.s32.f32 %v1085_v60  ;;  %v577_v10 = vadd.s32 %v545_v63, %v478_v61  ;;  %v578_v11 = vadd.s32 %v546_v0, %v479_v62 }
  0xab   : > { %v642_v14 = vsel %vm610_vm12, 1, %v2259_v1  ;;  %v643_v15 = vsel %vm611_vm13, 1, %v2259_v1  ;;  %vm707_vm14 = vcmp.eq.s32.totalorder %v412_v9, %v2420_v22  ;;  %vm708_vm15 = vcmp.eq.s32.totalorder %v413_v55, %v2420_v22 }
  0xac   : > { %v1138_v16 = vpack.c.bf16 %v1117_v4, %v1116_v3  ;;  %v674_v17 = vadd.s32 %v642_v14, %v577_v10  ;;  %v675_v18 = vadd.s32 %v643_v15, %v578_v11  ;;  %v739_v19 = vsel %vm707_vm14, 1, %v2259_v1 }
  0xad   : > { %v740_v26 = vsel %vm708_vm15, 1, %v2259_v1  ;;  %vm804_vm0 = vcmp.eq.s32.totalorder %v412_v9, %v2422_v23  ;;  %vm805_vm1 = vcmp.eq.s32.totalorder %v413_v55, %v2422_v23  ;;  %vm903_vm2 = vcmp.eq.s32.totalorder %v412_v9, %v2424_v24 }
  0xae   : > { %1192 = vmatpush.bf16.msra.mxu1 %v1138_v16  ;;  %v771_v27 = vadd.s32 %v739_v19, %v674_v17  ;;  %v772_v28 = vadd.s32 %v740_v26, %v675_v18  ;;  %v836_v29 = vsel %vm804_vm0, 1, %v2259_v1  ;;  %v837_v5 = vsel %vm805_vm1, 1, %v2259_v1 }
  0xaf   : > { %vm904_vm4 = vcmp.eq.s32.totalorder %v413_v55, %v2424_v24  ;;  %v935_v6 = vsel %vm903_vm2, 1, %v2259_v1  ;;  %vm1002_vm3 = vcmp.eq.s32.totalorder %v412_v9, %v2426_v25  ;;  %vm1003_vm5 = vcmp.eq.s32.totalorder %v413_v55, %v2426_v25 }
  0xb0   : > { %v868_v30 = vadd.s32 %v836_v29, %v771_v27  ;;  %v869_v32 = vadd.s32 %v837_v5, %v772_v28  ;;  %v936_v34 = vsel %vm904_vm4, 1, %v2259_v1  ;;  %v1034_v7 = vsel %vm1002_vm3, 1, %v2259_v1 }
  0xb1   : > { %v1035_v13 = vsel %vm1003_vm5, 1, %v2259_v1  ;;  %vm462_vm6 = vcmp.eq.s32.totalorder %v2879_v53, %v2844_v31  ;;  %vm463_vm7 = vcmp.eq.s32.totalorder %v2882_v58, %v2844_v31  ;;  %vm529_vm8 = vcmp.eq.s32.totalorder %v2879_v53, %v2416_v20 }
  0xb2   : > { %v967_v35 = vadd.s32 %v935_v6, %v868_v30  ;;  %v968_v36 = vadd.s32 %v936_v34, %v869_v32  ;;  %v494_v37 = vsel %vm462_vm6, 1, %v2259_v1  ;;  %v495_v38 = vsel %vm463_vm7, 1, %v2259_v1 }
  0xb3   : > { %vm530_vm9 = vcmp.eq.s32.totalorder %v2882_v58, %v2416_v20  ;;  %v561_v40 = vsel %vm529_vm8, 1, %v2259_v1  ;;  %vm626_vm10 = vcmp.eq.s32.totalorder %v2879_v53, %v2418_v21  ;;  %vm627_vm11 = vcmp.eq.s32.totalorder %v2882_v58, %v2418_v21 }
  0xb4   : > { %v1066_v12 = vadd.s32 %v1034_v7, %v967_v35  ;;  %v1067_v33 = vadd.s32 %v1035_v13, %v968_v36  ;;  %v562_v41 = vsel %vm530_vm9, 1, %v2259_v1  ;;  %v593_v42 = vadd.s32 %v561_v40, %v494_v37  ;;  %v2986_v7 = vld [vmem:[%s3285_s4] sm:$0xf]  ;;  %v2991_v13 = vld [vmem:[%s3285_s4 + $0x4] sm:$0xf0] }
  0xb5   : > { %v594_v43 = vadd.s32 %v562_v41, %v495_v38  ;;  %v658_v44 = vsel %vm626_vm10, 1, %v2259_v1  ;;  %v659_v45 = vsel %vm627_vm11, 1, %v2259_v1  ;;  %vm723_vm12 = vcmp.eq.s32.totalorder %v2879_v53, %v2420_v22 }
  0xb6   : > { %v1098_v47 = vcvt.s32.f32 %v1066_v12  ;;  %v1099_v48 = vcvt.s32.f32 %v1067_v33  ;;  %v690_v49 = vadd.s32 %v658_v44, %v593_v42  ;;  %vm724_vm13 = vcmp.eq.s32.totalorder %v2882_v58, %v2420_v22 }
  0xb7   : > { %v691_v50 = vadd.s32 %v659_v45, %v594_v43  ;;  %v755_v51 = vsel %vm723_vm12, 1, %v2259_v1  ;;  %v756_v52 = vsel %vm724_vm13, 1, %v2259_v1  ;;  %vm820_vm14 = vcmp.eq.s32.totalorder %v2879_v53, %v2422_v23 }
  0xb8   : > { %v1129_v54 = vpack.c.bf16 %v1099_v48, %v1098_v47  ;;  %v787_v39 = vadd.s32 %v755_v51, %v690_v49  ;;  %vm821_vm15 = vcmp.eq.s32.totalorder %v2882_v58, %v2422_v23  ;;  %v852_v46 = vsel %vm820_vm14, 1, %v2259_v1 }
  0xb9   : > { %v788_v8 = vadd.s32 %v756_v52, %v691_v50  ;;  %v853_v9 = vsel %vm821_vm15, 1, %v2259_v1  ;;  %vm919_vm0 = vcmp.eq.s32.totalorder %v2879_v53, %v2424_v24  ;;  %vm920_vm1 = vcmp.eq.s32.totalorder %v2882_v58, %v2424_v24 }
  0xba   : > { %1174 = vmatpush.bf16.msra.mxu0 %v1129_v54  ;;  %v884_v55 = vadd.s32 %v852_v46, %v787_v39  ;;  %v951_v56 = vsel %vm919_vm0, 1, %v2259_v1  ;;  %v952_v57 = vsel %vm920_vm1, 1, %v2259_v1  ;;  %vm1018_vm2 = vcmp.eq.s32.totalorder %v2879_v53, %v2426_v25 }
  0xbb   : > { %v885_v59 = vadd.s32 %v853_v9, %v788_v8  ;;  %vm1019_vm4 = vcmp.eq.s32.totalorder %v2882_v58, %v2426_v25  ;;  %v1050_v60 = vsel %vm1018_vm2, 1, %v2259_v1  ;;  %v411_v61 = vadd.s32 8, %v2370_v2 }
  0xbc   : > { %v983_v62 = vadd.s32 %v951_v56, %v884_v55  ;;  %v1051_v63 = vsel %vm1019_vm4, 1, %v2259_v1  ;;  %vm444_vm3 = vcmp.eq.s32.totalorder %v2370_v2, %v2844_v31  ;;  %vm511_vm5 = vcmp.eq.s32.totalorder %v2370_v2, %v2416_v20 }
  0xbd   : > { %v984_v0 = vadd.s32 %v952_v57, %v885_v59  ;;  %vm445_vm6 = vcmp.eq.s32.totalorder %v411_v61, %v2844_v31  ;;  %v476_v53 = vsel %vm444_vm3, 1, %v2259_v1  ;;  %vm512_vm7 = vcmp.eq.s32.totalorder %v411_v61, %v2416_v20  ;;  %v1212_v57 = vld [vmem:[%s3287_s6] sm:$0xff] }
  0xbe   : > { %v1082_v58 = vadd.s32 %v1050_v60, %v983_v62  ;;  %v477_v3 = vsel %vm445_vm6, 1, %v2259_v1  ;;  %v543_v4 = vsel %vm511_vm5, 1, %v2259_v1  ;;  %v544_v10 = vsel %vm512_vm7, 1, %v2259_v1  ;;  %1218 = vperm.xlu1 %2159, %v1212_v57   ;;  %v1973_v57 = vld [vmem:[%s3287_s6 + $0x38] sm:$0xff] }
  0xbf   : > { %v1083_v11 = vadd.s32 %v1051_v63, %v984_v0  ;;  %v575_v14 = vadd.s32 %v543_v4, %v476_v53  ;;  %v576_v15 = vadd.s32 %v544_v10, %v477_v3  ;;  %vm608_vm8 = vcmp.eq.s32.totalorder %v2370_v2, %v2418_v21 }
  0xc0   : > { %v1114_v16 = vcvt.s32.f32 %v1082_v58  ;;  %vm609_vm9 = vcmp.eq.s32.totalorder %v411_v61, %v2418_v21  ;;  %v640_v17 = vsel %vm608_vm8, 1, %v2259_v1  ;;  %vm705_vm10 = vcmp.eq.s32.totalorder %v2370_v2, %v2420_v22 }
  0xc1   : > { %v1115_v18 = vcvt.s32.f32 %v1083_v11  ;;  %v641_v19 = vsel %vm609_vm9, 1, %v2259_v1  ;;  %v672_v26 = vadd.s32 %v640_v17, %v575_v14  ;;  %vm706_vm11 = vcmp.eq.s32.totalorder %v411_v61, %v2420_v22 }
  0xc2   : > { %v673_v27 = vadd.s32 %v641_v19, %v576_v15  ;;  %v737_v28 = vsel %vm705_vm10, 1, %v2259_v1  ;;  %v738_v29 = vsel %vm706_vm11, 1, %v2259_v1  ;;  %vm802_vm12 = vcmp.eq.s32.totalorder %v2370_v2, %v2422_v23  ;;  %v2090_v15 = vld [vmem:[%s3285_s4 + $0x4] sm:$0xf]  ;;  %v2093_v19 = vld [vmem:[%s3285_s4 + $0x14] sm:$0xf0] }
  0xc3   : > { %v1137_v5 = vpack.c.bf16 %v1115_v18, %v1114_v16  ;;  %v769_v6 = vadd.s32 %v737_v28, %v672_v26  ;;  %vm803_vm13 = vcmp.eq.s32.totalorder %v411_v61, %v2422_v23  ;;  %v834_v30 = vsel %vm802_vm12, 1, %v2259_v1  ;;  %v1944_v16 = vld [vmem:[%s3285_s4 + $0x8] sm:$0xf0]  ;;  %v1950_v18 = vld [vmem:[%s3285_s4 + $0x10] sm:$0xf] }
  0xc4   : > { %v770_v32 = vadd.s32 %v738_v29, %v673_v27  ;;  %v835_v34 = vsel %vm803_vm13, 1, %v2259_v1  ;;  %vm901_vm14 = vcmp.eq.s32.totalorder %v2370_v2, %v2424_v24  ;;  %vm902_vm15 = vcmp.eq.s32.totalorder %v411_v61, %v2424_v24  ;;  %v2092_v27 = vld [vmem:[%s3285_s4 + $0x14] sm:$0xf]  ;;  %v1952_v28 = vld [vmem:[%s3285_s4 + $0x18] sm:$0xf0] }
  0xc5   : > { %1193 = vmatpush.bf16.msra.mxu1 %v1137_v5  ;;  %v866_v35 = vadd.s32 %v834_v30, %v769_v6  ;;  %v933_v36 = vsel %vm901_vm14, 1, %v2259_v1  ;;  %v934_v37 = vsel %vm902_vm15, 1, %v2259_v1  ;;  %vm1000_vm0 = vcmp.eq.s32.totalorder %v2370_v2, %v2426_v25  ;;  %v1213_v5 = vld [vmem:[%s3287_s6 + $0x8] sm:$0xff]  ;;  %v1970_v6 = vld [vmem:[%s3287_s6 + $0x20] sm:$0xff] }
  0xc6   : > { %v867_v38 = vadd.s32 %v835_v34, %v770_v32  ;;  %vm1001_vm1 = vcmp.eq.s32.totalorder %v411_v61, %v2426_v25  ;;  %v1032_v40 = vsel %vm1000_vm0, 1, %v2259_v1  ;;  %v426_v12 = vadd.s32 128, %v2370_v2  ;;  %1223 = vperm.xlu1 %2159, %v1213_v5   ;;  %v1971_v30 = vld [vmem:[%s3287_s6 + $0x28] sm:$0xff]  ;;  %v1991_v32 = vld [vmem:[%s3287_s6 + $0x58] sm:$0xff]  ;;  %v1988_v34 = vld [vmem:[%s3287_s6 + $0x40] sm:$0xff] }
  0xc7   : > { %v965_v33 = vadd.s32 %v933_v36, %v866_v35  ;;  %v1033_v41 = vsel %vm1001_vm1, 1, %v2259_v1  ;;  %v427_v42 = vadd.s32 136, %v2370_v2  ;;  %v1943_v43 = vor.u32 %v2991_v13, %v2986_v7  ;;  %v2008_v7 = vld [vmem:[%s3287_s6 + $0x70] sm:$0xff]  ;;  %v2009_v35 = vld [vmem:[%s3287_s6 + $0x78] sm:$0xff]  ;;  %v2007_v36 = vld [vmem:[%s3287_s6 + $0x68] sm:$0xff] }
  0xc8   : > { %v966_v44 = vadd.s32 %v934_v37, %v867_v38  ;;  %vm460_vm2 = vcmp.eq.s32.totalorder %v426_v12, %v2844_v31  ;;  %vm527_vm4 = vcmp.eq.s32.totalorder %v426_v12, %v2416_v20  ;;  %vm624_vm3 = vcmp.eq.s32.totalorder %v426_v12, %v2418_v21  ;;  %v1501_v37 = vld [vmem:[%s3289_s8 + $0x10] sm:$0xff]  ;;  %v2071_v5 = vld [vmem:[%s3289_s8 + $0x68] sm:$0xff] }
  0xc9   : > { %v1064_v45 = vadd.s32 %v1032_v40, %v965_v33  ;;  %vm461_vm5 = vcmp.eq.s32.totalorder %v427_v42, %v2844_v31  ;;  %v492_v47 = vsel %vm460_vm2, 1, %v2259_v1  ;;  %vm528_vm6 = vcmp.eq.s32.totalorder %v427_v42, %v2416_v20  ;;  %v1500_v33 = vld [vmem:[%s3289_s8 + $0x8] sm:$0xff] }
  0xca   : > { %v1065_v48 = vadd.s32 %v1033_v41, %v966_v44  ;;  %v493_v2 = vsel %vm461_vm5, 1, %v2259_v1  ;;  %v559_v49 = vsel %vm527_vm4, 1, %v2259_v1  ;;  %v560_v50 = vsel %vm528_vm6, 1, %v2259_v1  ;;  %v2034_v44 = vld [vmem:[%s3289_s8 + $0x20] sm:$0xff] }
  0xcb   : > { %v1096_v51 = vcvt.s32.f32 %v1064_v45  ;;  %v591_v52 = vadd.s32 %v559_v49, %v492_v47  ;;  %v592_v54 = vadd.s32 %v560_v50, %v493_v2  ;;  %vm625_vm7 = vcmp.eq.s32.totalorder %v427_v42, %v2418_v21  ;;  %v1214_v21 = vld [vmem:[%s3287_s6 + $0x10] sm:$0xff]  ;;  %v2055_v2 = vld [vmem:[%s3289_s8 + $0x58] sm:$0xff] }
  0xcc   : > { %v1097_v39 = vcvt.s32.f32 %v1065_v48  ;;  %v656_v46 = vsel %vm624_vm3, 1, %v2259_v1  ;;  %v657_v31 = vsel %vm625_vm7, 1, %v2259_v1  ;;  %vm721_vm8 = vcmp.eq.s32.totalorder %v426_v12, %v2420_v22  ;;  %1228 = vperm.xlu0 %2158, %v1214_v21   ;;  %v2054_v47 = vld [vmem:[%s3289_s8 + $0x50] sm:$0xff] }
  0xcd   : > { %v688_v20 = vadd.s32 %v656_v46, %v591_v52  ;;  %v689_v8 = vadd.s32 %v657_v31, %v592_v54  ;;  %vm722_vm9 = vcmp.eq.s32.totalorder %v427_v42, %v2420_v22  ;;  %v753_v9 = vsel %vm721_vm8, 1, %v2259_v1  ;;  %v2053_v52 = vld [vmem:[%s3289_s8 + $0x48] sm:$0xff]  ;;  %v2070_v31 = vld [vmem:[%s3289_s8 + $0x60] sm:$0xff]  ;;  %v1972_v21 = vld [vmem:[%s3287_s6 + $0x30] sm:$0xff] }
  0xce   : > { %v1128_v55 = vpack.c.bf16 %v1097_v39, %v1096_v51  ;;  %v754_v56 = vsel %vm722_vm9, 1, %v2259_v1  ;;  %vm818_vm10 = vcmp.eq.s32.totalorder %v426_v12, %v2422_v23  ;;  %vm819_vm11 = vcmp.eq.s32.totalorder %v427_v42, %v2422_v23  ;;  %1295 = vperm.xlu1 %2159, %v1971_v30   ;;  %1300 = vperm.xlu2 %2160, %v1972_v21  }
  0xcf   : > { %v785_v59 = vadd.s32 %v753_v9, %v688_v20  ;;  %v786_v60 = vadd.s32 %v754_v56, %v689_v8  ;;  %v850_v22 = vsel %vm818_vm10, 1, %v2259_v1  ;;  %v851_v61 = vsel %vm819_vm11, 1, %v2259_v1  ;;  %v2094_v8 = vld [vmem:[%s3286_s5] sm:$0xff]  ;;  %v2072_v9 = vld [vmem:[%s3289_s8 + $0x70] sm:$0xff]  ;;  %v2095_v56 = vld [vmem:[%s3286_s5 + $0x8] sm:$0xff] }
  0xd0   : > { %1175 = vmatpush.bf16.msra.mxu0 %v1128_v55  ;;  %vm917_vm12 = vcmp.eq.s32.totalorder %v426_v12, %v2424_v24  ;;  %vm918_vm13 = vcmp.eq.s32.totalorder %v427_v42, %v2424_v24  ;;  %vm1016_vm14 = vcmp.eq.s32.totalorder %v426_v12, %v2426_v25  ;;  %vm1017_vm15 = vcmp.eq.s32.totalorder %v427_v42, %v2426_v25  ;;  %v1215_v24 = vld [vmem:[%s3287_s6 + $0x18] sm:$0xff]  ;;  %v1499_v12 = vld [vmem:[%s3289_s8] sm:$0xff] }
  0xd1   : > { %v882_v23 = vadd.s32 %v850_v22, %v785_v59  ;;  %v883_v62 = vadd.s32 %v851_v61, %v786_v60  ;;  %v949_v63 = vsel %vm917_vm12, 1, %v2259_v1  ;;  %v950_v0 = vsel %vm918_vm13, 1, %v2259_v1  ;;  %v2037_v42 = vld [vmem:[%s3289_s8 + $0x38] sm:$0xff]  ;;  %v1990_v60 = vld [vmem:[%s3287_s6 + $0x50] sm:$0xff]  ;;  %v1989_v61 = vld [vmem:[%s3287_s6 + $0x48] sm:$0xff] }
  0xd2   : > { %v1048_v53 = vsel %vm1016_vm14, 1, %v2259_v1  ;;  %v1049_v58 = vsel %vm1017_vm15, 1, %v2259_v1  ;;  %v1947_v17 = vor.u32 %v2090_v15, %v1944_v16  ;;  %v1951_v26 = vor.u32 %v2093_v19, %v1950_v18  ;;  %v2073_v55 = vld [vmem:[%s3289_s8 + $0x78] sm:$0xff]  ;;  %v2096_v19 = vld [vmem:[%s3286_s5 + $0x10] sm:$0xff] }
  0xd3   : > { %v981_v3 = vadd.s32 %v949_v63, %v882_v23  ;;  %v982_v4 = vadd.s32 %v950_v0, %v883_v62  ;;  %1176 = vmatmul.bf16.vlgmr.msra.gmra.mxu0 %v1943_v43  ;;  %v1955_v29 = vor.u32 %v2092_v27, %v1952_v28  ;;  %vm1246_vm0 = vcmask 261120   ;;  %v2006_v0 = vld [vmem:[%s3287_s6 + $0x60] sm:$0xff]  ;;  %v1502_v15 = vld [vmem:[%s3289_s8 + $0x18] sm:$0xff]  ;;  %v2035_v27 = vld [vmem:[%s3289_s8 + $0x28] sm:$0xff] }
  0xd4   : > { %1233 = vperm.xlu0 %2158, %v1215_v24   ;;  %v2097_v28 = vld [vmem:[%s3286_s5 + $0x18] sm:$0xff] }
  0xd5   : > { %v1080_v10 = vadd.s32 %v1048_v53, %v981_v3  ;;  %v1081_v11 = vadd.s32 %v1049_v58, %v982_v4 }
  0xd6   : > { %1361 = vperm.xlu1 %2159, %v1988_v34   ;;  %1305 = vperm.xlu2 %2160, %v1973_v57  }
  0xd7   : > { %v1112_v25 = vcvt.s32.f32 %v1080_v10  ;;  %v1113_v14 = vcvt.s32.f32 %v1081_v11 }
  0xd9   : > { %v1136_v1 = vpack.c.bf16 %v1113_v14, %v1112_v25 }
  0xdb   : > { %1194 = vmatpush.bf16.msra.mxu1 %v1136_v1 }
  0xdc   : > { %1290 = vperm.xlu0 %2158, %v1970_v6  }
  0xde   : > { %1195 = vmatmul.bf16.vlgmr.msra.gmra.mxu1 %v1947_v17  ;;  %1447 = vperm.xlu1 %2159, %v2009_v35  }
  0xdf   : > { %1371 = vperm.xlu2 %2160, %v1990_v60  }
  0xe3   : > { %1181 = vmatmul.bf16.gmra.mxu0 %v1951_v26  ;;  %v2036_v26 = vld [vmem:[%s3289_s8 + $0x30] sm:$0xff] }
  0xe4   : > { %1376 = vperm.xlu0 %2158, %v1991_v32  }
  0xe6   : > { %1515 = vperm.xlu1 %2159, %v1501_v37  }
  0xe7   : > { %1366 = vperm.xlu2 %2160, %v1989_v61   ;;  %v2101_v61 = vld [vmem:[%s3286_s5 + $0x38] sm:$0xff] }
  0xec   : > { %1442 = vperm.xlu0 %2158, %v2008_v7  }
  0xee   : > { %1200 = vmatmul.bf16.gmra.mxu1 %v1955_v29  ;;  %1510 = vperm.xlu1 %2159, %v1500_v33   ;;  %v2052_v29 = vld [vmem:[%s3289_s8 + $0x40] sm:$0xff] }
  0xef   : > { %1432 = vperm.xlu2 %2160, %v2006_v0  }
  0xf4   : > { %1437 = vperm.xlu0 %2158, %v2007_v36  }
  0xf6   : > { %1576 = vperm.xlu1 %2159, %v2034_v44  }
  0xf7   : > { %1520 = vperm.xlu2 %2160, %v1502_v15  }
  0xfc   : > { %1505 = vperm.xlu0 %2158, %v1499_v12  }
  0xfe   : > { %1662 = vperm.xlu1 %2159, %v2055_v2  }
  0xff   : > { %1586 = vperm.xlu2 %2160, %v2036_v26   ;;  %v2103_v26 = vld [vmem:[%s3288_s7 + $0x8] sm:$0xff] }
 0x104   : > { %1591 = vperm.xlu0 %2158, %v2037_v42  }
 0x106   : > { %1718 = vperm.xlu1 %2159, %v2070_v31  }
 0x107   : > { %1581 = vperm.xlu2 %2160, %v2035_v27  }
 0x10c   : > { %1657 = vperm.xlu0 %2158, %v2054_v47   ;;  %v2098_v47 = vld [vmem:[%s3286_s5 + $0x20] sm:$0xff] }
 0x10e   : > { %1733 = vperm.xlu1 %2159, %v2073_v55  }
 0x10f   : > { %1647 = vperm.xlu2 %2160, %v2052_v29  }
 0x114   : > { %1652 = vperm.xlu0 %2158, %v2053_v52  }
 0x117   : > { %1723 = vperm.xlu2 %2160, %v2071_v5  }
 0x11c   : > { %1728 = vperm.xlu0 %2158, %v2072_v9  }
 0x128   : > { %v1301_v32 = vpop.permute.xlu2 %1300 }
 0x130   : > { %v1219_v62 = vpop.permute.xlu1 %1218  ;;  %v1306_v35 = vpop.permute.xlu2 %1305 }
 0x138   : > { %v1224_v3 = vpop.permute.xlu1 %1223 }
 0x13e   : > { %v1229_v23 = vpop.permute.xlu0 %1228 }
 0x140   : > { %v1296_v7 = vpop.permute.xlu1 %1295 }
 0x146   : > { %v1234_v53 = vpop.permute.xlu0 %1233 }
 0x150   : > { %v1177_v13 = vpop.f32.mrf.mxu0 }
 0x158   : > { %v1179_v40 = vpop.f32.mrf.mxu0 }
 0x15b   : > { %v1196_v38 = vpop.f32.mrf.mxu1 }
 0x15c   : > { %v1197_v46 = vadd.f32 %v1196_v38, %v1177_v13 }
 0x160   : > { %v1182_v43 = vpop.f32.mrf.mxu0 }
 0x163   : > { %v1198_v41 = vpop.f32.mrf.mxu1 }
 0x164   : > { %v1199_v54 = vadd.f32 %v1198_v41, %v1179_v40  ;;  %v1291_v40 = vpop.permute.xlu0 %1290 }
 0x166   : > { %v1210_v20 = vpack.c.bf16 %v1199_v54, %v1197_v46 }
 0x168   : > { %v1184_v48 = vpop.f32.mrf.mxu0 }
 0x16b   : > { %v1201_v45 = vpop.f32.mrf.mxu1 }
 0x16c   : > { %v1202_v50 = vadd.f32 %v1201_v45, %v1182_v43  ;;  %v1377_v52 = vpop.permute.xlu0 %1376 }
 0x173   : > { %v1203_v49 = vpop.f32.mrf.mxu1 }
 0x174   : > { %v1204_v51 = vadd.f32 %v1203_v49, %v1184_v48  ;;  %v2099_v48 = vld [vmem:[%s3286_s5 + $0x28] sm:$0xff] }
 0x176   : > { %v1211_v39 = vpack.c.bf16 %v1204_v51, %v1202_v50  ;;  %v1372_v50 = vpop.permute.xlu2 %1371 }
 0x178   : > { %1259 = vmatpush.bf16.msra.mxu2 %v1211_v39 }
 0x17c   : > { %1260 = vmatpush.bf16.msra.mxu2 %v1210_v20 }
 0x17e   : > { %v1367_v39 = vpop.permute.xlu2 %1366 }
 0x17f   : > { %1964 = vmatmul.msk.bf16.vlgmr.msra.gmra.mxu2 %vm1246_vm0, %v2094_v8  ;;  %v1362_v8 = vpop.permute.xlu1 %1361 }
 0x18f   : > { %1965 = vmatmul.msk.bf16.gmra.mxu2 %vm1246_vm0, %v2095_v56 }
 0x202   : > { %v1262_v59 = vpop.f32.mrf.mxu2 }
 0x203   : > { %v1263_v11 = vadd.f32 %v1262_v59, %v1219_v62  ;;  %v1433_v62 = vpop.permute.xlu2 %1432 }
 0x205   : > { %v1272_v17 = vmax.f32 %v1263_v11, 0.0 }
 0x20a   : > { %v1264_v22 = vpop.f32.mrf.mxu2 }
 0x20b   : > { %v1265_v24 = vadd.f32 %v1264_v22, %v1224_v3  ;;  %v2100_v22 = vld [vmem:[%s3286_s5 + $0x30] sm:$0xff] }
 0x20d   : > { %v1273_v16 = vmax.f32 %v1265_v24, 0.0 }
 0x20f   : > { %v1281_v18 = vpack.c.bf16 %v1273_v16, %v1272_v17 }
 0x212   : > { %v1267_v63 = vpop.f32.mrf.mxu2 }
 0x213   : > { %v1268_v58 = vadd.f32 %v1267_v63, %v1229_v23  ;;  %v1443_v23 = vpop.permute.xlu0 %1442 }
 0x215   : > { %v1274_v25 = vmax.f32 %v1268_v58, 0.0 }
 0x21a   : > { %v1269_v4 = vpop.f32.mrf.mxu2 }
 0x21b   : > { %v1270_v10 = vadd.f32 %v1269_v4, %v1234_v53  ;;  %v1438_v53 = vpop.permute.xlu0 %1437 }
 0x21d   : > { %v1275_v14 = vmax.f32 %v1270_v10, 0.0  ;;  %v1448_v10 = vpop.permute.xlu1 %1447 }
 0x21f   : > { %v1282_v1 = vpack.c.bf16 %v1275_v14, %v1274_v25 }
 0x221   : > { %1330 = vmatpush.bf16.msra.mxu3 %v1282_v1 }
 0x225   : > { %1331 = vmatpush.bf16.msra.mxu3 %v1281_v18  ;;  %v1516_v29 = vpop.permute.xlu1 %1515 }
 0x228   : > { %1982 = vmatmul.msk.bf16.vlgmr.msra.gmra.mxu3 %vm1246_vm0, %v2096_v19  ;;  %v2102_v19 = vld [vmem:[%s3288_s7] sm:$0xff] }
 0x238   : > { %1983 = vmatmul.msk.bf16.gmra.mxu3 %vm1246_vm0, %v2097_v28 }
 0x2ab   : > { %v1333_v6 = vpop.f32.mrf.mxu3 }
 0x2ac   : > { %v1334_v12 = vadd.f32 %v1333_v6, %v1291_v40  ;;  %v1511_v6 = vpop.permute.xlu1 %1510 }
 0x2ae   : > { %v1343_v44 = vmax.f32 %v1334_v12, 0.0 }
 0x2b3   : > { %v1335_v30 = vpop.f32.mrf.mxu3 }
 0x2b4   : > { %v1336_v37 = vadd.f32 %v1335_v30, %v1296_v7 }
 0x2b6   : > { %v1344_v42 = vmax.f32 %v1336_v37, 0.0 }
 0x2b8   : > { %v1352_v45 = vpack.c.bf16 %v1344_v42, %v1343_v44  ;;  %v2104_v42 = vld [vmem:[%s3288_s7 + $0x10] sm:$0xff] }
 0x2bb   : > { %v1338_v34 = vpop.f32.mrf.mxu3 }
 0x2bc   : > { %v1339_v13 = vadd.f32 %v1338_v34, %v1301_v32  ;;  %v1521_v32 = vpop.permute.xlu2 %1520 }
 0x2be   : > { %v1345_v33 = vmax.f32 %v1339_v13, 0.0 }
 0x2c3   : > { %v1340_v36 = vpop.f32.mrf.mxu3 }
 0x2c4   : > { %v1341_v38 = vadd.f32 %v1340_v36, %v1306_v35  ;;  %v1506_v35 = vpop.permute.xlu0 %1505 }
 0x2c6   : > { %v1346_v41 = vmax.f32 %v1341_v38, 0.0 }
 0x2c8   : > { %v1353_v43 = vpack.c.bf16 %v1346_v41, %v1345_v33 }
 0x2ca   : > { %1401 = vmatpush.bf16.msrb.mxu2 %v1353_v43  ;;  %v2105_v43 = vld [vmem:[%s3288_s7 + $0x18] sm:$0xff] }
 0x2ce   : > { %1402 = vmatpush.bf16.msrb.mxu2 %v1352_v45 }
 0x2d1   : > { %2000 = vmatmul.msk.bf16.vlgmr.msrb.gmra.mxu2 %vm1246_vm0, %v2098_v47  ;;  %v1587_v47 = vpop.permute.xlu2 %1586 }
 0x2e1   : > { %2001 = vmatmul.msk.bf16.gmra.mxu2 %vm1246_vm0, %v2099_v48 }
 0x354   : > { %v1404_v2 = vpop.f32.mrf.mxu2 }
 0x355   : > { %v1405_v9 = vadd.f32 %v1404_v2, %v1362_v8  ;;  %v1592_v2 = vpop.permute.xlu0 %1591 }
 0x357   : > { %v1414_v59 = vmax.f32 %v1405_v9, 0.0 }
 0x35c   : > { %v1406_v49 = vpop.f32.mrf.mxu2 }
 0x35d   : > { %v1407_v31 = vadd.f32 %v1406_v49, %v1367_v39  ;;  %v1577_v39 = vpop.permute.xlu1 %1576 }
 0x35f   : > { %v1415_v21 = vmax.f32 %v1407_v31, 0.0 }
 0x361   : > { %v1423_v60 = vpack.c.bf16 %v1415_v21, %v1414_v59  ;;  %v2106_v21 = vld [vmem:[%s3288_s7 + $0x20] sm:$0xff] }
 0x364   : > { %v1409_v51 = vpop.f32.mrf.mxu2 }
 0x365   : > { %v1410_v54 = vadd.f32 %v1409_v51, %v1372_v50  ;;  %v1582_v50 = vpop.permute.xlu2 %1581 }
 0x367   : > { %v1416_v55 = vmax.f32 %v1410_v54, 0.0 }
 0x36c   : > { %v1411_v46 = vpop.f32.mrf.mxu2 }
 0x36d   : > { %v1412_v20 = vadd.f32 %v1411_v46, %v1377_v52 }
 0x36f   : > { %v1417_v56 = vmax.f32 %v1412_v20, 0.0 }
 0x371   : > { %v1424_v57 = vpack.c.bf16 %v1417_v56, %v1416_v55 }
 0x373   : > { %1472 = vmatpush.bf16.msrb.mxu3 %v1424_v57  ;;  %v2107_v57 = vld [vmem:[%s3288_s7 + $0x28] sm:$0xff] }
 0x377   : > { %1473 = vmatpush.bf16.msrb.mxu3 %v1423_v60 }
 0x37a   : > { %2018 = vmatmul.msk.bf16.vlgmr.msrb.gmra.mxu3 %vm1246_vm0, %v2100_v22  ;;  %v1658_v22 = vpop.permute.xlu0 %1657 }
 0x38a   : > { %2019 = vmatmul.msk.bf16.gmra.mxu3 %vm1246_vm0, %v2101_v61 }
 0x3fd   : > { %v1475_v63 = vpop.f32.mrf.mxu3 }
 0x3fe   : > { %v1476_v0 = vadd.f32 %v1475_v63, %v1433_v62  ;;  %v1653_v63 = vpop.permute.xlu0 %1652 }
 0x400   : > { %1485 = vst [vmem:[%s3184_s28] sm:$0xff] %v1476_v0  ;;  %v1489_v17 = vmax.f32 %v1476_v0, 0.0 }
 0x405   : > { %v1477_v58 = vpop.f32.mrf.mxu3 }
 0x406   : > { %v1478_v3 = vadd.f32 %v1477_v58, %v1438_v53 }
 0x408   : > { %1486 = vst [vmem:[%s3184_s28 + $0x8] sm:$0xff] %v1478_v3  ;;  %v1490_v16 = vmax.f32 %v1478_v3, 0.0  ;;  %v1648_v3 = vpop.permute.xlu2 %1647 }
 0x40a   : > { %v1497_v18 = vpack.c.bf16 %v1490_v16, %v1489_v17  ;;  %v2108_v16 = vld [vmem:[%s3288_s7 + $0x30] sm:$0xff] }
 0x40d   : > { %v1480_v4 = vpop.f32.mrf.mxu3 }
 0x40e   : > { %v1481_v24 = vadd.f32 %v1480_v4, %v1443_v23  ;;  %v1663_v23 = vpop.permute.xlu1 %1662 }
 0x410   : > { %1487 = vst [vmem:[%s3184_s28 + $0x10] sm:$0xff] %v1481_v24  ;;  %v1491_v14 = vmax.f32 %v1481_v24, 0.0 }
 0x415   : > { %v1482_v11 = vpop.f32.mrf.mxu3 }
 0x416   : > { %v1483_v25 = vadd.f32 %v1482_v11, %v1448_v10 }
 0x418   : > { %1488 = vst [vmem:[%s3184_s28 + $0x18] sm:$0xff] %v1483_v25  ;;  %v1492_v15 = vmax.f32 %v1483_v25, 0.0  ;;  %s2183_s28 = scalar_lea.hbm %s3291_s10, 64 }
 0x419   : > { %p2185_p1 = scmp.lt.s32.totalorder %s2183_s28, %s2179_s1 }
 0x41a   : > { %v1498_v1 = vpack.c.bf16 %v1492_v15, %v1491_v14 }
 0x41b   : > { %p2186_p2 = por %p2185_p1, %p2184_p0 }
 0x41c   : > { %1545 = vmatpush.bf16.msrb.mxu0 %v1498_v1  ;;  %v2109_v1 = vld [vmem:[%s3288_s7 + $0x38] sm:$0xff] }
 0x41d   : > { %p2187_p3 = pnand %p2186_p2, %p2182_p13 }
 0x420   : > { %1546 = vmatpush.bf16.msrb.mxu0 %v1497_v18 }
 0x423   : > { %2028 = vmatmul.msk.bf16.vlgmr.msrb.gmra.mxu0 %vm1246_vm0, %v2102_v19 }
 0x433   : > { %2029 = vmatmul.msk.bf16.gmra.mxu0 %vm1246_vm0, %v2103_v26 }
 0x4a0   : > { %v1548_v27 = vpop.f32.mrf.mxu0 }
 0x4a1   : > { %v1549_v36 = vadd.f32 %v1548_v27, %v1506_v35 }
 0x4a3   : > { %v1558_v33 = vmax.f32 %v1549_v36, 0.0 }
 0x4a8   : > { %v1550_v28 = vpop.f32.mrf.mxu0 }
 0x4a9   : > { %v1551_v7 = vadd.f32 %v1550_v28, %v1511_v6 }
 0x4ab   : > { %v1559_v40 = vmax.f32 %v1551_v7, 0.0 }
 0x4ad   : > { %v1567_v41 = vpack.c.bf16 %v1559_v40, %v1558_v33 }
 0x4b0   : > { %v1553_v5 = vpop.f32.mrf.mxu0 }
 0x4b1   : > { %v1554_v30 = vadd.f32 %v1553_v5, %v1516_v29 }
 0x4b3   : > { %v1560_v37 = vmax.f32 %v1554_v30, 0.0 }
 0x4b8   : > { %v1555_v34 = vpop.f32.mrf.mxu0 }
 0x4b9   : > { %v1556_v13 = vadd.f32 %v1555_v34, %v1521_v32 }
 0x4bb   : > { %v1561_v38 = vmax.f32 %v1556_v13, 0.0 }
 0x4bd   : > { %v1568_v12 = vpack.c.bf16 %v1561_v38, %v1560_v37 }
 0x4bf   : > { %1616 = vmatpush.bf16.msrb.mxu1 %v1568_v12 }
 0x4c3   : > { %1617 = vmatpush.bf16.msrb.mxu1 %v1567_v41 }
 0x4c6   : > { %2046 = vmatmul.msk.bf16.vlgmr.msrb.gmra.mxu1 %vm1246_vm0, %v2104_v42 }
 0x4d6   : > { %2047 = vmatmul.msk.bf16.gmra.mxu1 %vm1246_vm0, %v2105_v43 }
 0x543   : > { %v1619_v44 = vpop.f32.mrf.mxu1 }
 0x544   : > { %v1620_v46 = vadd.f32 %v1619_v44, %v1577_v39 }
 0x546   : > { %v1629_v55 = vmax.f32 %v1620_v46, 0.0 }
 0x54b   : > { %v1621_v45 = vpop.f32.mrf.mxu1 }
 0x54c   : > { %v1622_v52 = vadd.f32 %v1621_v45, %v1582_v50 }
 0x54e   : > { %v1630_v8 = vmax.f32 %v1622_v52, 0.0 }
 0x550   : > { %v1638_v56 = vpack.c.bf16 %v1630_v8, %v1629_v55 }
 0x553   : > { %v1624_v48 = vpop.f32.mrf.mxu1 }
 0x554   : > { %v1625_v49 = vadd.f32 %v1624_v48, %v1587_v47 }
 0x556   : > { %v1631_v31 = vmax.f32 %v1625_v49, 0.0 }
 0x55b   : > { %v1626_v51 = vpop.f32.mrf.mxu1 }
 0x55c   : > { %v1627_v54 = vadd.f32 %v1626_v51, %v1592_v2 }
 0x55e   : > { %v1632_v20 = vmax.f32 %v1627_v54, 0.0 }
 0x560   : > { %v1639_v9 = vpack.c.bf16 %v1632_v20, %v1631_v31 }
 0x562   : > { %1687 = vmatpush.bf16.msra.mxu2 %v1639_v9 }
 0x566   : > { %1688 = vmatpush.bf16.msra.mxu2 %v1638_v56 }
 0x569   : > { %2064 = vmatmul.msk.bf16.vlgmr.msra.gmra.mxu2 %vm1246_vm0, %v2106_v21 }
 0x579   : > { %2065 = vmatmul.msk.bf16.gmra.mxu2 %vm1246_vm0, %v2107_v57 }
 0x5ec   : > { %v1690_v59 = vpop.f32.mrf.mxu2 }
 0x5ed   : > { %v1691_v4 = vadd.f32 %v1690_v59, %v1648_v3 }
 0x5ef   : > { %v1700_v14 = vmax.f32 %v1691_v4, 0.0 }
 0x5f4   : > { %v1692_v60 = vpop.f32.mrf.mxu2 }
 0x5f5   : > { %v1693_v53 = vadd.f32 %v1692_v60, %v1653_v63 }
 0x5f7   : > { %v1701_v11 = vmax.f32 %v1693_v53, 0.0 }
 0x5f9   : > { %v1709_v15 = vpack.c.bf16 %v1701_v11, %v1700_v14 }
 0x5fc   : > { %v1695_v61 = vpop.f32.mrf.mxu2 }
 0x5fd   : > { %v1696_v62 = vadd.f32 %v1695_v61, %v1658_v22 }
 0x5ff   : > { %v1702_v24 = vmax.f32 %v1696_v62, 0.0 }
 0x604   : > { %v1697_v0 = vpop.f32.mrf.mxu2 }
 0x605   : > { %v1698_v58 = vadd.f32 %v1697_v0, %v1663_v23 }
 0x607   : > { %v1703_v10 = vmax.f32 %v1698_v58, 0.0 }
 0x609   : > { %v1710_v25 = vpack.c.bf16 %v1703_v10, %v1702_v24 }
 0x60b   : > { %1758 = vmatpush.bf16.msra.mxu3 %v1710_v25 }
 0x60f   : > { %1759 = vmatpush.bf16.msra.mxu3 %v1709_v15 }
 0x612   : > { %2082 = vmatmul.msk.bf16.vlgmr.msra.gmra.mxu3 %vm1246_vm0, %v2108_v16 }
 0x622   : > { %2083 = vmatmul.msk.bf16.gmra.mxu3 %vm1246_vm0, %v2109_v1 }
 0x623   : > { %2190 = shalt.err (!%p2187_p3)
}
 0x624   : > { %s2260_s29 = smov 128   ;;  %s2261_s30 = smov 256   ;;  %v1719_v17 = vpop.permute.xlu1 %1718  ;;  %v1724_v26 = vpop.permute.xlu2 %1723 }
 0x625   : > { %s2262_s11 = smov 8   ;;  %s3303_s2 = sshll.u32 %s3179_s0, 5  ;;  %v1729_v29 = vpop.permute.xlu0 %1728 }
 0x626   : > { %2111 = dma.vmem_to_hbm [thread:$0]  (%p2356_p5), %s1809_s26, 512, %s1811_s25, %s1781_s12, %s2260_s29, %s2261_s30, %s2262_s11  }
 0x627   : > { %s387_s3 = scalar_lea.vmem [#allocation2], %s3303_s2  ;;  %s1791_s25 = scalar_lea.hbm %s3290_s9, %s2086_s27 }
 0x628   : > { %s1792_s26 = sshll.u32 %s387_s3, 4  ;;  %s1794_s12 = sshll.u32 %s1791_s25, 4  ;;  %s1793_s26 = int_to_ptr.vmem [resolvable:$true] %s1792_s26  ;;  %s1795_s12 = int_to_ptr.hbm [resolvable:$true] %s1794_s12 }
 0x629   : > { %s1776_s20 = scalar_lea.sflag [#allocation3], %s3179_s0  ;;  %s2205_s21 = sshra.s32 %s1795_s12, 4  ;;  %s2206_s21 = int_to_ptr.hbm [resolvable:$true] %s2205_s21 }
 0x62a   : > { %s2207_s28 = scalar_lea.hbm %s2206_s21, 32  ;;  %s2211_s27 = scalar_lea.hbm %s3290_s9, 64 }
 0x62b   : > { %p2208_p4 = scmp.ne.s32.totalorder %s2206_s21, %s2207_s28  ;;  %p2212_p9 = scmp.lt.s32.totalorder %s2206_s21, %s3290_s9 }
 0x62c   : > { %v1734_v30 = vpop.permute.xlu1 %1733  ;;  %p2213_p10 = scmp.lt.s32.totalorder %s2211_s27, %s2207_s28 }
 0x62d   : > { %p2209_p7 = pnand %p2208_p4, %p2356_p5 }
 0x62e   : > { %p2214_p11 = por %p2213_p10, %p2212_p9 }
 0x62f   : > { %p2210_p8 = pneg %p2209_p7 }
 0x631   : > { %p2215_p12 = pnand %p2214_p11, %p2210_p8 }
 0x695   : > { %v1761_v18 = vpop.f32.mrf.mxu3 }
 0x696   : > { %v1762_v19 = vadd.f32 %v1761_v18, %v1719_v17 }
 0x698   : > { %1771 = vst [vmem:[%s387_s3] sm:$0xff] %v1762_v19 }
 0x69d   : > { %v1763_v27 = vpop.f32.mrf.mxu3 }
 0x69e   : > { %v1764_v28 = vadd.f32 %v1763_v27, %v1724_v26 }
 0x6a0   : > { %1772 = vst [vmem:[%s387_s3 + $0x8] sm:$0xff] %v1764_v28 }
 0x6a5   : > { %v1766_v5 = vpop.f32.mrf.mxu3 }
 0x6a6   : > { %v1767_v6 = vadd.f32 %v1766_v5, %v1729_v29 }
 0x6a8   : > { %1773 = vst [vmem:[%s387_s3 + $0x10] sm:$0xff] %v1767_v6 }
 0x6ad   : > { %v1768_v32 = vpop.f32.mrf.mxu3 }
 0x6ae   : > { %v1769_v34 = vadd.f32 %v1768_v32, %v1734_v30 }
 0x6b0   : > { %1774 = vst [vmem:[%s387_s3 + $0x18] sm:$0xff] %v1769_v34 }
 0x6b1   : > { %2218 = shalt.err (!%p2215_p12)
}
 0x6b2   : > { %2110 = dma.vmem_to_hbm [thread:$0]  (%p2356_p5), %s1793_s26, 512, %s1795_s12, %s1776_s20, %s2260_s29, %s2261_s30, %s2262_s11  }
 0x6b3 PF: > { %p2121_p13 = scmp.ge.s32.totalorder %s2257_s16, 2  ;;  %s1825_s0 = sand.u32 1, %s2245_s13  }
 0x6b4   : > { %s1826_s3 = scalar_lea.sflag [#allocation3], %s1825_s0 }
 0x6b5   : > { %p2115_p0 = pnand %p2121_p13, %p2360_p6 }
 0x6b7   : > { %p2116_p1 = pneg %p2115_p0 }
 0x6b9   : > { %2236 = dma.done.wait (%p2116_p1), %s1826_s3, 512  }
 0x6ba   : > { %2238 = vsyncadd (%p2116_p1), %s1826_s3, 4294966784  ;;  %s1836_s25 = scalar_lea.sflag [#allocation5], %s1825_s0 }
 0x6bb   : > { %2240 = dma.done.wait (%p2116_p1), %s1836_s25, 512  }
 0x6bc   : > { %2242 = vsyncadd (%p2116_p1), %s1836_s25, 4294966784  ;;  %p24_p5 = scmp.ge.s32.totalorder %s2343_s19, 4   ;;  %s3304_s13 = smov %s2249_s14 }
 0x6bd   : > { %s3305_s14 = smov %s2253_s15  ;;  %s3306_s15 = smov %s2354_s22 }
 0x6be   : > { %s3307_s16 = smov %s2343_s19  ;;  %26 = sbr.rel (!%p24_p5) target bundleno = 10 (0xa), region = 129 }
 0x6c3   :  { %1842 = vsyncpa [#allocation3], 1 }
 0x6c4   :  { %1844 = vsyncpa [#allocation3 + $0x1], 1 }
 0x6c5   :  { %1845 = vsyncpa [#allocation5], 1 }
 0x6c6   :  { %1847 = vsyncpa [#allocation5 + $0x1], 1 }

</bundles_post_ra>
